<compile_context>
chip_gen: v6e
topology: v6e:2x2x1
jax: 0.10.0
libtpu: 0.0.40
codegen_flags: <defaults>
</compile_context>

<pallas_src>
import functools

import jax
import jax.numpy as jnp
from jax import lax
from jax.experimental import pallas as pl
from jax.experimental.pallas import tpu as pltpu

HEADS = 8
HIDDEN = 8          # per-head hidden size -> 64 concat
PAD_CLASSES = 128   # lane-dense layer-2 output slab (sliced to num_classes outside)
NEG_INF = -1e30


def _attn_softmax_agg(xp, dst, src_t, adj_t, heads, f_out,
                      bd_mask=None, sum_mat=None):
    """Masked per-head softmax + aggregation, all heads lane-stacked.

    xp      : (N, heads*f_out)  transformed features
    dst     : (N, heads)        per-(target node, head) attention logit
    src_t   : (heads, N)        per-(head, source node) attention logit
    adj_t   : (N, heads*N)      adjacency tiled per head (adj for heads == 1)
    bd_mask : (heads*N, heads*f_out) block-diagonal 0/1 mask   (heads > 1)
    sum_mat : (heads*N, heads)       block-ones sum matrix     (heads > 1)
    returns (N, heads*f_out)
    """
    n = adj_t.shape[0]
    # Stack every head's (N, N) logit block along lanes -> (N, heads*N).
    e = jnp.concatenate(
        [dst[:, h:h + 1] + src_t[h:h + 1, :] for h in range(heads)], axis=1)
    # leaky_relu(0.2), then mask non-edges — elementwise ops run once on the
    # full lane-dense tile instead of per head.
    e = jnp.where(e > 0.0, e, 0.2 * e)
    e = jnp.where(adj_t > 0.0, e, NEG_INF)
    # Per-head (lane-block) row max for the numerically stable softmax.
    m_blk = [jnp.max(e[:, h * n:(h + 1) * n], axis=1, keepdims=True)
             for h in range(heads)]
    m_b = jnp.concatenate([jnp.broadcast_to(m, (n, n)) for m in m_blk], axis=1)
    p = jnp.exp(e - m_b) * adj_t                       # exact zeros off-graph

    if heads == 1:
        agg = jnp.dot(p, xp, preferred_element_type=jnp.float32)      # (N, F)
        inv = pl.reciprocal(jnp.sum(p, axis=1, keepdims=True), approx=True)
        return agg * inv

    # One MXU matmul for all heads: p (N, H*N) @ block-diag stacked features
    # (H*N, H*F) replaces H tiny (N,N)@(N,F) matmuls. Normalization is linear,
    # so it is deferred and applied to the (smaller) aggregated tile.
    x_bd = jnp.concatenate([xp] * heads, axis=0) * bd_mask            # (H*N, H*F)
    agg = jnp.dot(p, x_bd, preferred_element_type=jnp.float32)        # (N, H*F)
    denom = jnp.dot(p, sum_mat, preferred_element_type=jnp.float32)   # (N, H)
    inv = pl.reciprocal(denom, approx=True)
    inv_b = jnp.concatenate(
        [jnp.broadcast_to(inv[:, h:h + 1], (n, f_out)) for h in range(heads)],
        axis=1)                                                       # (N, H*F)
    return agg * inv_b


def _gat_net_kernel(x_ref, w1_ref, asrc1_ref, b1_ref, w2_ref, asrc2_ref,
                    b2_ref, adj_ref, adj_t_ref, bd_mask_ref, sum_mat_ref,
                    out_ref, *, heads, f1, pad_classes):
    x = x_ref[...]
    adj = adj_ref[...]
    adj_t = adj_t_ref[...]

    # ---- layer 1: GATConv(F_in -> f1, heads, concat) + ELU -----------------
    hf = heads * f1
    # att_dst is folded into the weight matrix -> one MXU pass yields xp1 + dst1.
    z1 = jnp.dot(x, w1_ref[...], preferred_element_type=jnp.float32)  # (N, HF+H)
    xp1 = z1[:, :hf]                                                   # (N, H*f1)
    dst1 = z1[:, hf:hf + heads]                                        # (N, H)
    # All heads' src logits directly in (H, N) row orientation via one NT matmul
    # against the block-diagonal att_src matrix (no per-head matvecs).
    src1_t = lax.dot_general(asrc1_ref[...], xp1, (((1,), (1,)), ((), ())),
                             preferred_element_type=jnp.float32)       # (H, N)
    h1 = _attn_softmax_agg(xp1, dst1, src1_t, adj_t, heads, f1,
                           bd_mask_ref[...], sum_mat_ref[...])         # (N, H*f1)
    h1 = h1 + b1_ref[...]
    h1 = jnp.where(h1 > 0.0, h1, jnp.exp(jnp.minimum(h1, 0.0)) - 1.0)  # ELU

    # ---- layer 2: GATConv(H*f1 -> C, heads=1) + log_softmax ----------------
    z2 = jnp.dot(h1, w2_ref[...], preferred_element_type=jnp.float32)  # (N, padC+1)
    xp2 = z2[:, :pad_classes]          # lane-dense; columns >= C are exactly 0
    dst2 = z2[:, pad_classes:pad_classes + 1]                          # (N, 1)
    src2_t = lax.dot_general(asrc2_ref[...], xp2, (((1,), (1,)), ((), ())),
                             preferred_element_type=jnp.float32)       # (1, N)
    o2 = _attn_softmax_agg(xp2, dst2, src2_t, adj, 1, pad_classes)     # (N, 128)
    o2 = o2 + b2_ref[...]              # padded class columns carry -1e30 bias
    # log_softmax over the padded 128 lanes (padded cols contribute exp(.) = 0,
    # so the real num_classes columns are identical to an unpadded log_softmax).
    mx = jnp.max(o2, axis=1, keepdims=True)
    zc = o2 - mx
    out = zc - jnp.log(jnp.sum(jnp.exp(zc), axis=1, keepdims=True))
    out_ref[...] = out.astype(out_ref.dtype)


def net_forward(x, adj, params):
    n, f_in = x.shape
    h, f1 = HEADS, HIDDEN
    w1, w2 = params["w1"], params["w2"]
    num_classes = w2.shape[1]

    # ---- fold attention projections into the weight matmuls (wrapper side) ----
    w_dst1 = jnp.einsum('khf,hf->kh', w1.reshape(f_in, h, f1), params["adst1"])
    w1_aug = jnp.concatenate([w1, w_dst1], axis=1)                # (F_in, H*f1+H)
    asrc1_bd = (params["asrc1"][:, None, :] *
                jnp.eye(h, dtype=jnp.float32)[:, :, None]).reshape(h, h * f1)

    w2_pad = jnp.pad(w2, ((0, 0), (0, PAD_CLASSES - num_classes)))
    w_dst2 = w2 @ params["adst2"].T                               # (H*f1, 1)
    w2_aug = jnp.concatenate([w2_pad, w_dst2], axis=1)            # (H*f1, padC+1)
    asrc2_pad = jnp.pad(params["asrc2"],
                        ((0, 0), (0, PAD_CLASSES - num_classes)))
    b2_pad = jnp.pad(params["b2"], ((0, 0), (0, PAD_CLASSES - num_classes)),
                     constant_values=NEG_INF)

    # ---- constant structural inputs precomputed once (no in-kernel iota) ----
    adj_tiled = jnp.tile(adj, (1, h))                             # (N, H*N)
    rows = jnp.arange(h * n)
    bd_mask = (rows[:, None] // n ==
               jnp.arange(h * f1)[None, :] // f1).astype(jnp.float32)   # (H*N, H*f1)
    sum_mat = (rows[:, None] // n ==
               jnp.arange(h)[None, :]).astype(jnp.float32)              # (H*N, H)

    kernel = functools.partial(_gat_net_kernel, heads=h, f1=f1,
                               pad_classes=PAD_CLASSES)
    vmem = pl.BlockSpec(memory_space=pltpu.MemorySpace.VMEM)
    # TODO(synk): at real Cora scale (N~2708) the fused, grid-less, dense-f32-adj
    # design must become a row-tiled grid (parallel dimension_semantics for the
    # second TensorCore on v7x, int8 adjacency, per-layer calls) to fit 64 MiB
    # VMEM; at N=16 a single fused grid-less call is optimal.
    out_pad = pl.pallas_call(
        kernel,
        out_shape=jax.ShapeDtypeStruct((n, PAD_CLASSES), jnp.float32),
        in_specs=[vmem] * 11,      # everything is tiny -> fully VMEM resident
        out_specs=vmem,
    )(x, w1_aug, asrc1_bd, params["b1"], w2_aug, asrc2_pad, b2_pad,
      adj, adj_tiled, bd_mask, sum_mat)
    return out_pad[:, :num_classes]


def init_params(key, num_features, hidden_per_head, heads, num_classes):
    ks = jax.random.split(key, 8)

    def glorot(k, shape):
        fan_in, fan_out = shape[-2], shape[-1]
        s = jnp.sqrt(6.0 / (fan_in + fan_out))
        return jax.random.uniform(k, shape, jnp.float32, -s, s)

    return {
        "w1":    glorot(ks[0], (num_features, heads * hidden_per_head)),
        "asrc1": glorot(ks[1], (heads, hidden_per_head)),
        "adst1": glorot(ks[2], (heads, hidden_per_head)),
        "b1":    jnp.zeros((1, heads * hidden_per_head), jnp.float32),
        "w2":    glorot(ks[3], (heads * hidden_per_head, num_classes)),
        "asrc2": glorot(ks[4], (1, num_classes)),
        "adst2": glorot(ks[5], (1, num_classes)),
        "b2":    jnp.zeros((1, num_classes), jnp.float32),
    }


def gat_reference(x, adj, params):
    """Pure-JAX reference with PyG GATConv eval-mode semantics."""
    def layer(xin, w, asrc, adst, b, heads):
        f = asrc.shape[1]
        xp = xin @ w
        outs = []
        for h in range(heads):
            xh = xp[:, h * f:(h + 1) * f]
            src = xh @ asrc[h]
            dst = xh @ adst[h]
            e = dst[:, None] + src[None, :]
            e = jnp.where(e > 0, e, 0.2 * e)
            e = jnp.where(adj > 0, e, NEG_INF)
            a = jax.nn.softmax(e, axis=1)
            outs.append(a @ xh)
        return jnp.concatenate(outs, axis=1) + b

    h1 = jax.nn.elu(layer(x, params["w1"], params["asrc1"], params["adst1"],
                          params["b1"], HEADS))
    o = layer(h1, params["w2"], params["asrc2"], params["adst2"],
              params["b2"], 1)
    return jax.nn.log_softmax(o, axis=1)


if __name__ == "__main__":
    N = 16            # number of graph nodes (stand-in for Cora nodes)
    F_IN = 32         # num_features
    CLASSES = 7       # Cora num_classes

    key = jax.random.PRNGKey(0)
    k_x, k_src, k_dst, k_p = jax.random.split(key, 4)

    x = jax.random.normal(k_x, (N, F_IN), jnp.float32)

    # synthetic edge_index -> dense adjacency mask (self loops, as GATConv adds)
    num_edges = 48
    src = jax.random.randint(k_src, (num_edges,), 0, N)
    dst = jax.random.randint(k_dst, (num_edges,), 0, N)
    adj = jnp.zeros((N, N), jnp.float32).at[dst, src].set(1.0)
    adj = jnp.maximum(adj, jnp.eye(N, dtype=jnp.float32))

    params = init_params(k_p, F_IN, HIDDEN, HEADS, CLASSES)

    out = jax.jit(net_forward)(x, adj, params)
    out = jax.block_until_ready(out)

    assert out.shape == (N, CLASSES)
    # rows of log_softmax should exp-sum to ~1
    assert jnp.allclose(jnp.sum(jnp.exp(out), axis=1), 1.0, atol=1e-4)
    # match the pure-JAX reference (loose tol: kernel uses approx reciprocal)
    ref = gat_reference(x, adj, params)
    assert jnp.allclose(out, ref, atol=2e-2, rtol=2e-2), \
        float(jnp.max(jnp.abs(out - ref)))
    print("KERNEL_OK")
</pallas_src>

<mosaic_0001>
module attributes {stable_mosaic.version = 11 : i64} {
  func.func @_gat_net_kernel(%arg0: memref<16x32xf32, #tpu.memory_space<vmem>>, %arg1: memref<32x72xf32, #tpu.memory_space<vmem>>, %arg2: memref<8x64xf32, #tpu.memory_space<vmem>>, %arg3: memref<1x64xf32, #tpu.memory_space<vmem>>, %arg4: memref<64x129xf32, #tpu.memory_space<vmem>>, %arg5: memref<1x128xf32, #tpu.memory_space<vmem>>, %arg6: memref<1x128xf32, #tpu.memory_space<vmem>>, %arg7: memref<16x16xf32, #tpu.memory_space<vmem>>, %arg8: memref<16x128xf32, #tpu.memory_space<vmem>>, %arg9: memref<128x64xf32, #tpu.memory_space<vmem>>, %arg10: memref<128x8xf32, #tpu.memory_space<vmem>>, %arg11: memref<16x128xf32, #tpu.memory_space<vmem>>) attributes {dimension_semantics = [], scalar_prefetch = 0 : i64, scratch_operands = 0 : i64, tpu.core_type = #tpu.core_type<tc>} {
    %c0 = arith.constant 0 : index
    %c0_0 = arith.constant 0 : index
    %0 = vector.load %arg0[%c0, %c0_0] : memref<16x32xf32, #tpu.memory_space<vmem>>, vector<16x32xf32>
    %c0_1 = arith.constant 0 : index
    %c0_2 = arith.constant 0 : index
    %1 = vector.load %arg7[%c0_1, %c0_2] : memref<16x16xf32, #tpu.memory_space<vmem>>, vector<16x16xf32>
    %c0_3 = arith.constant 0 : index
    %c0_4 = arith.constant 0 : index
    %2 = vector.load %arg8[%c0_3, %c0_4] : memref<16x128xf32, #tpu.memory_space<vmem>>, vector<16x128xf32>
    %c0_5 = arith.constant 0 : index
    %c0_6 = arith.constant 0 : index
    %3 = vector.load %arg1[%c0_5, %c0_6] : memref<32x72xf32, #tpu.memory_space<vmem>>, vector<32x72xf32>
    %cst = arith.constant dense<0.000000e+00> : vector<16x72xf32>
    %4 = tpu.matmul %0, %3, %cst {dimension_numbers = #tpu.dot_dimension_numbers<[1], [0], [0], [1], [0, 0, 1, 1], [], []>} : vector<16x32xf32>, vector<32x72xf32>, vector<16x72xf32> -> vector<16x72xf32>
    %5 = vector.extract_strided_slice %4 {offsets = [0, 0], sizes = [16, 64], strides = [1, 1]} : vector<16x72xf32> to vector<16x64xf32>
    %6 = vector.extract_strided_slice %4 {offsets = [0, 64], sizes = [16, 8], strides = [1, 1]} : vector<16x72xf32> to vector<16x8xf32>
    %c0_7 = arith.constant 0 : index
    %c0_8 = arith.constant 0 : index
    %7 = vector.load %arg2[%c0_7, %c0_8] : memref<8x64xf32, #tpu.memory_space<vmem>>, vector<8x64xf32>
    %cst_9 = arith.constant dense<0.000000e+00> : vector<8x16xf32>
    %8 = tpu.matmul %7, %5, %cst_9 {dimension_numbers = #tpu.dot_dimension_numbers<[1], [1], [0], [0], [0, 0, 1, 0], [], []>} : vector<8x64xf32>, vector<16x64xf32>, vector<8x16xf32> -> vector<8x16xf32>
    %c0_10 = arith.constant 0 : index
    %c0_11 = arith.constant 0 : index
    %9 = vector.load %arg9[%c0_10, %c0_11] : memref<128x64xf32, #tpu.memory_space<vmem>>, vector<128x64xf32>
    %c0_12 = arith.constant 0 : index
    %c0_13 = arith.constant 0 : index
    %10 = vector.load %arg10[%c0_12, %c0_13] : memref<128x8xf32, #tpu.memory_space<vmem>>, vector<128x8xf32>
    %11 = vector.extract_strided_slice %6 {offsets = [0, 0], sizes = [16, 1], strides = [1, 1]} : vector<16x8xf32> to vector<16x1xf32>
    %12 = vector.extract_strided_slice %8 {offsets = [0, 0], sizes = [1, 16], strides = [1, 1]} : vector<8x16xf32> to vector<1x16xf32>
    %13 = vector.broadcast %11 : vector<16x1xf32> to vector<16x16xf32>
    %14 = vector.broadcast %12 : vector<1x16xf32> to vector<16x16xf32>
    %15 = arith.addf %13, %14 : vector<16x16xf32>
    %16 = vector.extract_strided_slice %6 {offsets = [0, 1], sizes = [16, 1], strides = [1, 1]} : vector<16x8xf32> to vector<16x1xf32>
    %17 = vector.extract_strided_slice %8 {offsets = [1, 0], sizes = [1, 16], strides = [1, 1]} : vector<8x16xf32> to vector<1x16xf32>
    %18 = vector.broadcast %16 : vector<16x1xf32> to vector<16x16xf32>
    %19 = vector.broadcast %17 : vector<1x16xf32> to vector<16x16xf32>
    %20 = arith.addf %18, %19 : vector<16x16xf32>
    %21 = vector.extract_strided_slice %6 {offsets = [0, 2], sizes = [16, 1], strides = [1, 1]} : vector<16x8xf32> to vector<16x1xf32>
    %22 = vector.extract_strided_slice %8 {offsets = [2, 0], sizes = [1, 16], strides = [1, 1]} : vector<8x16xf32> to vector<1x16xf32>
    %23 = vector.broadcast %21 : vector<16x1xf32> to vector<16x16xf32>
    %24 = vector.broadcast %22 : vector<1x16xf32> to vector<16x16xf32>
    %25 = arith.addf %23, %24 : vector<16x16xf32>
    %26 = vector.extract_strided_slice %6 {offsets = [0, 3], sizes = [16, 1], strides = [1, 1]} : vector<16x8xf32> to vector<16x1xf32>
    %27 = vector.extract_strided_slice %8 {offsets = [3, 0], sizes = [1, 16], strides = [1, 1]} : vector<8x16xf32> to vector<1x16xf32>
    %28 = vector.broadcast %26 : vector<16x1xf32> to vector<16x16xf32>
    %29 = vector.broadcast %27 : vector<1x16xf32> to vector<16x16xf32>
    %30 = arith.addf %28, %29 : vector<16x16xf32>
    %31 = vector.extract_strided_slice %6 {offsets = [0, 4], sizes = [16, 1], strides = [1, 1]} : vector<16x8xf32> to vector<16x1xf32>
    %32 = vector.extract_strided_slice %8 {offsets = [4, 0], sizes = [1, 16], strides = [1, 1]} : vector<8x16xf32> to vector<1x16xf32>
    %33 = vector.broadcast %31 : vector<16x1xf32> to vector<16x16xf32>
    %34 = vector.broadcast %32 : vector<1x16xf32> to vector<16x16xf32>
    %35 = arith.addf %33, %34 : vector<16x16xf32>
    %36 = vector.extract_strided_slice %6 {offsets = [0, 5], sizes = [16, 1], strides = [1, 1]} : vector<16x8xf32> to vector<16x1xf32>
    %37 = vector.extract_strided_slice %8 {offsets = [5, 0], sizes = [1, 16], strides = [1, 1]} : vector<8x16xf32> to vector<1x16xf32>
    %38 = vector.broadcast %36 : vector<16x1xf32> to vector<16x16xf32>
    %39 = vector.broadcast %37 : vector<1x16xf32> to vector<16x16xf32>
    %40 = arith.addf %38, %39 : vector<16x16xf32>
    %41 = vector.extract_strided_slice %6 {offsets = [0, 6], sizes = [16, 1], strides = [1, 1]} : vector<16x8xf32> to vector<16x1xf32>
    %42 = vector.extract_strided_slice %8 {offsets = [6, 0], sizes = [1, 16], strides = [1, 1]} : vector<8x16xf32> to vector<1x16xf32>
    %43 = vector.broadcast %41 : vector<16x1xf32> to vector<16x16xf32>
    %44 = vector.broadcast %42 : vector<1x16xf32> to vector<16x16xf32>
    %45 = arith.addf %43, %44 : vector<16x16xf32>
    %46 = vector.extract_strided_slice %6 {offsets = [0, 7], sizes = [16, 1], strides = [1, 1]} : vector<16x8xf32> to vector<16x1xf32>
    %47 = vector.extract_strided_slice %8 {offsets = [7, 0], sizes = [1, 16], strides = [1, 1]} : vector<8x16xf32> to vector<1x16xf32>
    %48 = vector.broadcast %46 : vector<16x1xf32> to vector<16x16xf32>
    %49 = vector.broadcast %47 : vector<1x16xf32> to vector<16x16xf32>
    %50 = arith.addf %48, %49 : vector<16x16xf32>
    %51 = tpu.concatenate %15, %20, %25, %30, %35, %40, %45, %50 in 1 : vector<16x16xf32>, vector<16x16xf32>, vector<16x16xf32>, vector<16x16xf32>, vector<16x16xf32>, vector<16x16xf32>, vector<16x16xf32>, vector<16x16xf32> -> vector<16x128xf32>
    %cst_14 = arith.constant 0.000000e+00 : f32
    %52 = vector.broadcast %cst_14 : f32 to vector<16x128xf32>
    %53 = arith.cmpf ogt, %51, %52 : vector<16x128xf32>
    %cst_15 = arith.constant 2.000000e-01 : f32
    %54 = vector.broadcast %cst_15 : f32 to vector<16x128xf32>
    %55 = arith.mulf %54, %51 : vector<16x128xf32>
    %56 = arith.select %53, %51, %55 : vector<16x128xi1>, vector<16x128xf32>
    %cst_16 = arith.constant 0.000000e+00 : f32
    %57 = vector.broadcast %cst_16 : f32 to vector<16x128xf32>
    %58 = arith.cmpf ogt, %2, %57 : vector<16x128xf32>
    %cst_17 = arith.constant -1.000000e+30 : f32
    %59 = vector.broadcast %cst_17 : f32 to vector<16x128xf32>
    %60 = arith.select %58, %56, %59 : vector<16x128xi1>, vector<16x128xf32>
    %61 = vector.extract_strided_slice %60 {offsets = [0, 0], sizes = [16, 16], strides = [1, 1]} : vector<16x128xf32> to vector<16x16xf32>
    %cst_18 = arith.constant dense<0xFF800000> : vector<16xf32>
    %62 = vector.multi_reduction <maximumf>, %61, %cst_18 [1] : vector<16x16xf32> to vector<16xf32>
    %63 = vector.shape_cast %62 : vector<16xf32> to vector<16x1xf32>
    %64 = vector.extract_strided_slice %60 {offsets = [0, 16], sizes = [16, 16], strides = [1, 1]} : vector<16x128xf32> to vector<16x16xf32>
    %cst_19 = arith.constant dense<0xFF800000> : vector<16xf32>
    %65 = vector.multi_reduction <maximumf>, %64, %cst_19 [1] : vector<16x16xf32> to vector<16xf32>
    %66 = vector.shape_cast %65 : vector<16xf32> to vector<16x1xf32>
    %67 = vector.extract_strided_slice %60 {offsets = [0, 32], sizes = [16, 16], strides = [1, 1]} : vector<16x128xf32> to vector<16x16xf32>
    %cst_20 = arith.constant dense<0xFF800000> : vector<16xf32>
    %68 = vector.multi_reduction <maximumf>, %67, %cst_20 [1] : vector<16x16xf32> to vector<16xf32>
    %69 = vector.shape_cast %68 : vector<16xf32> to vector<16x1xf32>
    %70 = vector.extract_strided_slice %60 {offsets = [0, 48], sizes = [16, 16], strides = [1, 1]} : vector<16x128xf32> to vector<16x16xf32>
    %cst_21 = arith.constant dense<0xFF800000> : vector<16xf32>
    %71 = vector.multi_reduction <maximumf>, %70, %cst_21 [1] : vector<16x16xf32> to vector<16xf32>
    %72 = vector.shape_cast %71 : vector<16xf32> to vector<16x1xf32>
    %73 = vector.extract_strided_slice %60 {offsets = [0, 64], sizes = [16, 16], strides = [1, 1]} : vector<16x128xf32> to vector<16x16xf32>
    %cst_22 = arith.constant dense<0xFF800000> : vector<16xf32>
    %74 = vector.multi_reduction <maximumf>, %73, %cst_22 [1] : vector<16x16xf32> to vector<16xf32>
    %75 = vector.shape_cast %74 : vector<16xf32> to vector<16x1xf32>
    %76 = vector.extract_strided_slice %60 {offsets = [0, 80], sizes = [16, 16], strides = [1, 1]} : vector<16x128xf32> to vector<16x16xf32>
    %cst_23 = arith.constant dense<0xFF800000> : vector<16xf32>
    %77 = vector.multi_reduction <maximumf>, %76, %cst_23 [1] : vector<16x16xf32> to vector<16xf32>
    %78 = vector.shape_cast %77 : vector<16xf32> to vector<16x1xf32>
    %79 = vector.extract_strided_slice %60 {offsets = [0, 96], sizes = [16, 16], strides = [1, 1]} : vector<16x128xf32> to vector<16x16xf32>
    %cst_24 = arith.constant dense<0xFF800000> : vector<16xf32>
    %80 = vector.multi_reduction <maximumf>, %79, %cst_24 [1] : vector<16x16xf32> to vector<16xf32>
    %81 = vector.shape_cast %80 : vector<16xf32> to vector<16x1xf32>
    %82 = vector.extract_strided_slice %60 {offsets = [0, 112], sizes = [16, 16], strides = [1, 1]} : vector<16x128xf32> to vector<16x16xf32>
    %cst_25 = arith.constant dense<0xFF800000> : vector<16xf32>
    %83 = vector.multi_reduction <maximumf>, %82, %cst_25 [1] : vector<16x16xf32> to vector<16xf32>
    %84 = vector.shape_cast %83 : vector<16xf32> to vector<16x1xf32>
    %85 = vector.shape_cast %63 : vector<16x1xf32> to vector<16x1xf32>
    %86 = vector.broadcast %85 : vector<16x1xf32> to vector<16x16xf32>
    %87 = vector.shape_cast %66 : vector<16x1xf32> to vector<16x1xf32>
    %88 = vector.broadcast %87 : vector<16x1xf32> to vector<16x16xf32>
    %89 = vector.shape_cast %69 : vector<16x1xf32> to vector<16x1xf32>
    %90 = vector.broadcast %89 : vector<16x1xf32> to vector<16x16xf32>
    %91 = vector.shape_cast %72 : vector<16x1xf32> to vector<16x1xf32>
    %92 = vector.broadcast %91 : vector<16x1xf32> to vector<16x16xf32>
    %93 = vector.shape_cast %75 : vector<16x1xf32> to vector<16x1xf32>
    %94 = vector.broadcast %93 : vector<16x1xf32> to vector<16x16xf32>
    %95 = vector.shape_cast %78 : vector<16x1xf32> to vector<16x1xf32>
    %96 = vector.broadcast %95 : vector<16x1xf32> to vector<16x16xf32>
    %97 = vector.shape_cast %81 : vector<16x1xf32> to vector<16x1xf32>
    %98 = vector.broadcast %97 : vector<16x1xf32> to vector<16x16xf32>
    %99 = vector.shape_cast %84 : vector<16x1xf32> to vector<16x1xf32>
    %100 = vector.broadcast %99 : vector<16x1xf32> to vector<16x16xf32>
    %101 = tpu.concatenate %86, %88, %90, %92, %94, %96, %98, %100 in 1 : vector<16x16xf32>, vector<16x16xf32>, vector<16x16xf32>, vector<16x16xf32>, vector<16x16xf32>, vector<16x16xf32>, vector<16x16xf32>, vector<16x16xf32> -> vector<16x128xf32>
    %102 = arith.subf %60, %101 : vector<16x128xf32>
    %103 = math.exp %102 : vector<16x128xf32>
    %104 = arith.mulf %103, %2 : vector<16x128xf32>
    %105 = tpu.concatenate %5, %5, %5, %5, %5, %5, %5, %5 in 0 : vector<16x64xf32>, vector<16x64xf32>, vector<16x64xf32>, vector<16x64xf32>, vector<16x64xf32>, vector<16x64xf32>, vector<16x64xf32>, vector<16x64xf32> -> vector<128x64xf32>
    %106 = arith.mulf %105, %9 : vector<128x64xf32>
    %cst_26 = arith.constant dense<0.000000e+00> : vector<16x64xf32>
    %107 = tpu.matmul %104, %106, %cst_26 {dimension_numbers = #tpu.dot_dimension_numbers<[1], [0], [0], [1], [0, 0, 1, 1], [], []>} : vector<16x128xf32>, vector<128x64xf32>, vector<16x64xf32> -> vector<16x64xf32>
    %cst_27 = arith.constant dense<0.000000e+00> : vector<16x8xf32>
    %108 = tpu.matmul %104, %10, %cst_27 {dimension_numbers = #tpu.dot_dimension_numbers<[1], [0], [0], [1], [0, 0, 1, 1], [], []>} : vector<16x128xf32>, vector<128x8xf32>, vector<16x8xf32> -> vector<16x8xf32>
    %109 = tpu.reciprocal %108 {approx = true} : vector<16x8xf32> -> vector<16x8xf32>
    %110 = vector.extract_strided_slice %109 {offsets = [0, 0], sizes = [16, 1], strides = [1, 1]} : vector<16x8xf32> to vector<16x1xf32>
    %111 = vector.shape_cast %110 : vector<16x1xf32> to vector<16x1xf32>
    %112 = vector.broadcast %111 : vector<16x1xf32> to vector<16x8xf32>
    %113 = vector.extract_strided_slice %109 {offsets = [0, 1], sizes = [16, 1], strides = [1, 1]} : vector<16x8xf32> to vector<16x1xf32>
    %114 = vector.shape_cast %113 : vector<16x1xf32> to vector<16x1xf32>
    %115 = vector.broadcast %114 : vector<16x1xf32> to vector<16x8xf32>
    %116 = vector.extract_strided_slice %109 {offsets = [0, 2], sizes = [16, 1], strides = [1, 1]} : vector<16x8xf32> to vector<16x1xf32>
    %117 = vector.shape_cast %116 : vector<16x1xf32> to vector<16x1xf32>
    %118 = vector.broadcast %117 : vector<16x1xf32> to vector<16x8xf32>
    %119 = vector.extract_strided_slice %109 {offsets = [0, 3], sizes = [16, 1], strides = [1, 1]} : vector<16x8xf32> to vector<16x1xf32>
    %120 = vector.shape_cast %119 : vector<16x1xf32> to vector<16x1xf32>
    %121 = vector.broadcast %120 : vector<16x1xf32> to vector<16x8xf32>
    %122 = vector.extract_strided_slice %109 {offsets = [0, 4], sizes = [16, 1], strides = [1, 1]} : vector<16x8xf32> to vector<16x1xf32>
    %123 = vector.shape_cast %122 : vector<16x1xf32> to vector<16x1xf32>
    %124 = vector.broadcast %123 : vector<16x1xf32> to vector<16x8xf32>
    %125 = vector.extract_strided_slice %109 {offsets = [0, 5], sizes = [16, 1], strides = [1, 1]} : vector<16x8xf32> to vector<16x1xf32>
    %126 = vector.shape_cast %125 : vector<16x1xf32> to vector<16x1xf32>
    %127 = vector.broadcast %126 : vector<16x1xf32> to vector<16x8xf32>
    %128 = vector.extract_strided_slice %109 {offsets = [0, 6], sizes = [16, 1], strides = [1, 1]} : vector<16x8xf32> to vector<16x1xf32>
    %129 = vector.shape_cast %128 : vector<16x1xf32> to vector<16x1xf32>
    %130 = vector.broadcast %129 : vector<16x1xf32> to vector<16x8xf32>
    %131 = vector.extract_strided_slice %109 {offsets = [0, 7], sizes = [16, 1], strides = [1, 1]} : vector<16x8xf32> to vector<16x1xf32>
    %132 = vector.shape_cast %131 : vector<16x1xf32> to vector<16x1xf32>
    %133 = vector.broadcast %132 : vector<16x1xf32> to vector<16x8xf32>
    %134 = tpu.concatenate %112, %115, %118, %121, %124, %127, %130, %133 in 1 : vector<16x8xf32>, vector<16x8xf32>, vector<16x8xf32>, vector<16x8xf32>, vector<16x8xf32>, vector<16x8xf32>, vector<16x8xf32>, vector<16x8xf32> -> vector<16x64xf32>
    %135 = arith.mulf %107, %134 : vector<16x64xf32>
    %c0_28 = arith.constant 0 : index
    %c0_29 = arith.constant 0 : index
    %136 = vector.load %arg3[%c0_28, %c0_29] : memref<1x64xf32, #tpu.memory_space<vmem>>, vector<1x64xf32>
    %137 = vector.broadcast %136 : vector<1x64xf32> to vector<16x64xf32>
    %138 = arith.addf %135, %137 : vector<16x64xf32>
    %cst_30 = arith.constant 0.000000e+00 : f32
    %139 = vector.broadcast %cst_30 : f32 to vector<16x64xf32>
    %140 = arith.cmpf ogt, %138, %139 : vector<16x64xf32>
    %cst_31 = arith.constant 0.000000e+00 : f32
    %141 = vector.broadcast %cst_31 : f32 to vector<16x64xf32>
    %142 = arith.minimumf %138, %141 : vector<16x64xf32>
    %143 = math.exp %142 : vector<16x64xf32>
    %cst_32 = arith.constant 1.000000e+00 : f32
    %144 = vector.broadcast %cst_32 : f32 to vector<16x64xf32>
    %145 = arith.subf %143, %144 : vector<16x64xf32>
    %146 = arith.select %140, %138, %145 : vector<16x64xi1>, vector<16x64xf32>
    %c0_33 = arith.constant 0 : index
    %c0_34 = arith.constant 0 : index
    %147 = vector.load %arg4[%c0_33, %c0_34] : memref<64x129xf32, #tpu.memory_space<vmem>>, vector<64x129xf32>
    %cst_35 = arith.constant dense<0.000000e+00> : vector<16x129xf32>
    %148 = tpu.matmul %146, %147, %cst_35 {dimension_numbers = #tpu.dot_dimension_numbers<[1], [0], [0], [1], [0, 0, 1, 1], [], []>} : vector<16x64xf32>, vector<64x129xf32>, vector<16x129xf32> -> vector<16x129xf32>
    %149 = vector.extract_strided_slice %148 {offsets = [0, 0], sizes = [16, 128], strides = [1, 1]} : vector<16x129xf32> to vector<16x128xf32>
    %150 = vector.extract_strided_slice %148 {offsets = [0, 128], sizes = [16, 1], strides = [1, 1]} : vector<16x129xf32> to vector<16x1xf32>
    %c0_36 = arith.constant 0 : index
    %c0_37 = arith.constant 0 : index
    %151 = vector.load %arg5[%c0_36, %c0_37] : memref<1x128xf32, #tpu.memory_space<vmem>>, vector<1x128xf32>
    %cst_38 = arith.constant dense<0.000000e+00> : vector<1x16xf32>
    %152 = tpu.matmul %151, %149, %cst_38 {dimension_numbers = #tpu.dot_dimension_numbers<[1], [1], [0], [0], [0, 0, 1, 0], [], []>} : vector<1x128xf32>, vector<16x128xf32>, vector<1x16xf32> -> vector<1x16xf32>
    %153 = vector.broadcast %150 : vector<16x1xf32> to vector<16x16xf32>
    %154 = vector.broadcast %152 : vector<1x16xf32> to vector<16x16xf32>
    %155 = arith.addf %153, %154 : vector<16x16xf32>
    %cst_39 = arith.constant 0.000000e+00 : f32
    %156 = vector.broadcast %cst_39 : f32 to vector<16x16xf32>
    %157 = arith.cmpf ogt, %155, %156 : vector<16x16xf32>
    %cst_40 = arith.constant 2.000000e-01 : f32
    %158 = vector.broadcast %cst_40 : f32 to vector<16x16xf32>
    %159 = arith.mulf %158, %155 : vector<16x16xf32>
    %160 = arith.select %157, %155, %159 : vector<16x16xi1>, vector<16x16xf32>
    %cst_41 = arith.constant 0.000000e+00 : f32
    %161 = vector.broadcast %cst_41 : f32 to vector<16x16xf32>
    %162 = arith.cmpf ogt, %1, %161 : vector<16x16xf32>
    %cst_42 = arith.constant -1.000000e+30 : f32
    %163 = vector.broadcast %cst_42 : f32 to vector<16x16xf32>
    %164 = arith.select %162, %160, %163 : vector<16x16xi1>, vector<16x16xf32>
    %cst_43 = arith.constant dense<0xFF800000> : vector<16xf32>
    %165 = vector.multi_reduction <maximumf>, %164, %cst_43 [1] : vector<16x16xf32> to vector<16xf32>
    %166 = vector.shape_cast %165 : vector<16xf32> to vector<16x1xf32>
    %167 = vector.shape_cast %166 : vector<16x1xf32> to vector<16x1xf32>
    %168 = vector.broadcast %167 : vector<16x1xf32> to vector<16x16xf32>
    %169 = arith.subf %164, %168 : vector<16x16xf32>
    %170 = math.exp %169 : vector<16x16xf32>
    %171 = arith.mulf %170, %1 : vector<16x16xf32>
    %cst_44 = arith.constant dense<0.000000e+00> : vector<16x128xf32>
    %172 = tpu.matmul %171, %149, %cst_44 {dimension_numbers = #tpu.dot_dimension_numbers<[1], [0], [0], [1], [0, 0, 1, 1], [], []>} : vector<16x16xf32>, vector<16x128xf32>, vector<16x128xf32> -> vector<16x128xf32>
    %cst_45 = arith.constant dense<0.000000e+00> : vector<16xf32>
    %173 = vector.multi_reduction <add>, %171, %cst_45 [1] : vector<16x16xf32> to vector<16xf32>
    %174 = vector.shape_cast %173 : vector<16xf32> to vector<16x1xf32>
    %175 = tpu.reciprocal %174 {approx = true} : vector<16x1xf32> -> vector<16x1xf32>
    %176 = vector.broadcast %175 : vector<16x1xf32> to vector<16x128xf32>
    %177 = arith.mulf %172, %176 : vector<16x128xf32>
    %c0_46 = arith.constant 0 : index
    %c0_47 = arith.constant 0 : index
    %178 = vector.load %arg6[%c0_46, %c0_47] : memref<1x128xf32, #tpu.memory_space<vmem>>, vector<1x128xf32>
    %179 = vector.broadcast %178 : vector<1x128xf32> to vector<16x128xf32>
    %180 = arith.addf %177, %179 : vector<16x128xf32>
    %cst_48 = arith.constant dense<0xFF800000> : vector<16xf32>
    %181 = vector.multi_reduction <maximumf>, %180, %cst_48 [1] : vector<16x128xf32> to vector<16xf32>
    %182 = vector.shape_cast %181 : vector<16xf32> to vector<16x1xf32>
    %183 = vector.broadcast %182 : vector<16x1xf32> to vector<16x128xf32>
    %184 = arith.subf %180, %183 : vector<16x128xf32>
    %185 = math.exp %184 : vector<16x128xf32>
    %cst_49 = arith.constant dense<0.000000e+00> : vector<16xf32>
    %186 = vector.multi_reduction <add>, %185, %cst_49 [1] : vector<16x128xf32> to vector<16xf32>
    %187 = vector.shape_cast %186 : vector<16xf32> to vector<16x1xf32>
    %188 = math.log %187 : vector<16x1xf32>
    %189 = vector.broadcast %188 : vector<16x1xf32> to vector<16x128xf32>
    %190 = arith.subf %184, %189 : vector<16x128xf32>
    %c0_50 = arith.constant 0 : index
    %c0_51 = arith.constant 0 : index
    %191 = vector.load %arg11[%c0_50, %c0_51] : memref<16x128xf32, #tpu.memory_space<vmem>>, vector<16x128xf32>
    tpu.vector_store %arg11[%c0_50, %c0_51], %190 {strides = array<i32>} : memref<16x128xf32, #tpu.memory_space<vmem>>, vector<16x128xf32>,
    return
  }
}

</mosaic_0001>

<bundles_post_ra>
// kernel: tile.9
= control target key start
LH: loop header
LB: loop body
LE: loop exit
PB: predicated region body
PF: predicated region fallthrough
CT: control target
= control target key end

     0   :  { %vm4_vm0 = vcmask 1047556   ;;  %s209_s14 = smov 96   ;;  %s210_s19 = smov 112   ;;  %vm6_vm1 = vcmask 130048   ;;  %vm25_vm2 = vcmask 1048448   ;;  %vm46_vm3 = vcmask 917248   ;;  %s388_s0 = inlined_call_operand.vmem [shape: f32[16,8,16], index: 0, kind: input, shape index: {}]   ;;  %s389_s1 = inlined_call_operand.vmem [shape: f32[16,128], index: 1, kind: output, shape index: {}]  }
   0x1   :  { %v172_v0 = vld [vmem:[%s388_s0 + $0x6] ss:$8 sm:$0xf]   ;;  %v167_v3 = vld [vmem:[%s388_s0 + $0x7] ss:$8 sm:$0xf]  }
   0x2   :  { %v173_v1 = vld [vmem:[%s388_s0 + $0x6] ss:$8 sm:$0xf0]   ;;  %v168_v4 = vld [vmem:[%s388_s0 + $0x7] ss:$8 sm:$0xf0]  }
   0x3   :  { %v43_v2 = vsel %vm4_vm0, %v173_v1, %v172_v0  ;;  %v22_v5 = vsel %vm4_vm0, %v168_v4, %v167_v3  ;;  %v174_v6 = vld [vmem:[%s388_s0 + $0x46] ss:$8 sm:$0xf]   ;;  %v169_v9 = vld [vmem:[%s388_s0 + $0x47] ss:$8 sm:$0xf]  }
   0x4   :  { %44 = vrot.lane.b32.xlu1 %v43_v2, %s209_s14  ;;  %v175_v7 = vld [vmem:[%s388_s0 + $0x46] ss:$8 sm:$0xf0]   ;;  %23 = vrot.lane.b32.xlu0 %v22_v5, %s210_s19  ;;  %v170_v10 = vld [vmem:[%s388_s0 + $0x47] ss:$8 sm:$0xf0]  }
   0x5   :  { %v53_v8 = vsel %vm4_vm0, %v175_v7, %v174_v6  ;;  %v32_v11 = vsel %vm4_vm0, %v170_v10, %v169_v9  ;;  %v179_v12 = vld [vmem:[%s388_s0 + $0x45] ss:$8 sm:$0xf]   ;;  %v184_v18 = vld [vmem:[%s388_s0 + $0x44] ss:$8 sm:$0xf]  }
   0x6   :  { %v180_v13 = vld [vmem:[%s388_s0 + $0x45] ss:$8 sm:$0xf0]   ;;  %v185_v19 = vld [vmem:[%s388_s0 + $0x44] ss:$8 sm:$0xf0]  }
   0x7   :  { %v177_v14 = vld [vmem:[%s388_s0 + $0x5] ss:$8 sm:$0xf]   ;;  %v74_v16 = vsel %vm4_vm0, %v180_v13, %v179_v12  ;;  %v182_v20 = vld [vmem:[%s388_s0 + $0x4] ss:$8 sm:$0xf]   ;;  %v95_v22 = vsel %vm4_vm0, %v185_v19, %v184_v18 }
   0x8   :  { %54 = vrot.lane.b32.xlu1 %v53_v8, %s209_s14  ;;  %v178_v15 = vld [vmem:[%s388_s0 + $0x5] ss:$8 sm:$0xf0]   ;;  %33 = vrot.lane.b32.xlu0 %v32_v11, %s210_s19  ;;  %v183_v21 = vld [vmem:[%s388_s0 + $0x4] ss:$8 sm:$0xf0]  }
   0x9   :  { %v64_v17 = vsel %vm4_vm0, %v178_v15, %v177_v14  ;;  %s211_s11 = smov 80   ;;  %v85_v23 = vsel %vm4_vm0, %v183_v21, %v182_v20  ;;  %v189_v24 = vld [vmem:[%s388_s0 + $0x43] ss:$8 sm:$0xf]   ;;  %s212_s20 = smov 64   ;;  %vm67_vm4 = vcmask 786048  }
   0xa   :  { %v190_v25 = vld [vmem:[%s388_s0 + $0x43] ss:$8 sm:$0xf0]   ;;  %v194_v28 = vld [vmem:[%s388_s0 + $0x42] ss:$8 sm:$0xf]  }
   0xb   :  { %v187_v26 = vld [vmem:[%s388_s0 + $0x3] ss:$8 sm:$0xf]   ;;  %v195_v29 = vld [vmem:[%s388_s0 + $0x42] ss:$8 sm:$0xf0]   ;;  %v116_v30 = vsel %vm4_vm0, %v190_v25, %v189_v24 }
   0xc   :  { %75 = vrot.lane.b32.xlu1 %v74_v16, %s211_s11  ;;  %65 = vrot.lane.b32.xlu0 %v64_v17, %s211_s11  ;;  %v188_v27 = vld [vmem:[%s388_s0 + $0x3] ss:$8 sm:$0xf0]   ;;  %v192_v31 = vld [vmem:[%s388_s0 + $0x2] ss:$8 sm:$0xf]   ;;  %v137_v40 = vsel %vm4_vm0, %v195_v29, %v194_v28 }
   0xd   :  { %v2_v32 = vld [vmem:[%s388_s0] ss:$8 sm:$0xf]   ;;  %v106_v33 = vsel %vm4_vm0, %v188_v27, %v187_v26  ;;  %v193_v36 = vld [vmem:[%s388_s0 + $0x2] ss:$8 sm:$0xf0]  }
   0xe   :  { %v3_v34 = vld [vmem:[%s388_s0] ss:$8 sm:$0xf0]   ;;  %s213_s8 = smov 48   ;;  %v127_v41 = vsel %vm4_vm0, %v193_v36, %v192_v31  ;;  %s215_s21 = smov 16   ;;  %vm88_vm5 = vcmask 654848  }
   0xf   :  { %v164_v35 = vld [vmem:[%s388_s0 + $0x40] ss:$8 sm:$0xf]   ;;  %v5_v37 = vsel %vm4_vm0, %v3_v34, %v2_v32  ;;  %v199_v42 = vld [vmem:[%s388_s0 + $0x41] ss:$8 sm:$0xf]  }
  0x10   :  { %96 = vrot.lane.b32.xlu1 %v95_v22, %s212_s20  ;;  %86 = vrot.lane.b32.xlu0 %v85_v23, %s212_s20  ;;  %v165_v38 = vld [vmem:[%s388_s0 + $0x40] ss:$8 sm:$0xf0]   ;;  %7 = vst.msk [vmem:[%s389_s1] sm:$0xff] %vm6_vm1, %v5_v37   ;;  %vm109_vm6 = vcmask 523648   ;;  %vm130_vm7 = vcmask 392448  }
  0x11   :  { %v13_v39 = vsel %vm4_vm0, %v165_v38, %v164_v35  ;;  %v200_v43 = vld [vmem:[%s388_s0 + $0x41] ss:$8 sm:$0xf0]   ;;  %vm151_vm8 = vcmask 261248  }
  0x12   :  { %166 = vst.msk [vmem:[%s389_s1 + $0x8] sm:$0xff] %vm6_vm1, %v13_v39   ;;  %v197_v44 = vld [vmem:[%s388_s0 + $0x1] ss:$8 sm:$0xf]   ;;  %v158_v46 = vsel %vm4_vm0, %v200_v43, %v199_v42 }
  0x13   :  { %v198_v45 = vld [vmem:[%s388_s0 + $0x1] ss:$8 sm:$0xf0]   ;;  %s214_s0 = smov 32  }
  0x14   :  { %117 = vrot.lane.b32.xlu1 %v116_v30, %s213_s8  ;;  %107 = vrot.lane.b32.xlu0 %v106_v33, %s213_s8  ;;  %v148_v47 = vsel %vm4_vm0, %v198_v45, %v197_v44 }
  0x18   :  { %138 = vrot.lane.b32.xlu1 %v137_v40, %s214_s0  ;;  %128 = vrot.lane.b32.xlu0 %v127_v41, %s214_s0 }
  0x1c   :  { %159 = vrot.lane.b32.xlu1 %v158_v46, %s215_s21  ;;  %149 = vrot.lane.b32.xlu0 %v148_v47, %s215_s21 }
  0x76   :  { %v45_v48 = vpop.permute.xlu1 %44   ;;  %v24_v49 = vpop.permute.xlu0 %23  }
  0x77   :  { %26 = vst.msk [vmem:[%s389_s1] sm:$0xff] %vm25_vm2, %v24_v49  }
  0x78   :  { %47 = vst.msk [vmem:[%s389_s1] sm:$0xff] %vm46_vm3, %v45_v48  }
  0x7a   :  { %v55_v50 = vpop.permute.xlu1 %54   ;;  %v34_v51 = vpop.permute.xlu0 %33  }
  0x7b   :  { %171 = vst.msk [vmem:[%s389_s1 + $0x8] sm:$0xff] %vm25_vm2, %v34_v51  }
  0x7c   :  { %176 = vst.msk [vmem:[%s389_s1 + $0x8] sm:$0xff] %vm46_vm3, %v55_v50  }
  0x7e   :  { %v76_v52 = vpop.permute.xlu1 %75   ;;  %v66_v53 = vpop.permute.xlu0 %65  }
  0x7f   :  { %181 = vst.msk [vmem:[%s389_s1 + $0x8] sm:$0xff] %vm67_vm4, %v76_v52   ;;  %68 = vst.msk [vmem:[%s389_s1] sm:$0xff] %vm67_vm4, %v66_v53  }
  0x82   :  { %v97_v54 = vpop.permute.xlu1 %96   ;;  %v87_v55 = vpop.permute.xlu0 %86  }
  0x83   :  { %186 = vst.msk [vmem:[%s389_s1 + $0x8] sm:$0xff] %vm88_vm5, %v97_v54   ;;  %89 = vst.msk [vmem:[%s389_s1] sm:$0xff] %vm88_vm5, %v87_v55  }
  0x86   :  { %v118_v56 = vpop.permute.xlu1 %117   ;;  %v108_v57 = vpop.permute.xlu0 %107  }
  0x87   :  { %191 = vst.msk [vmem:[%s389_s1 + $0x8] sm:$0xff] %vm109_vm6, %v118_v56   ;;  %110 = vst.msk [vmem:[%s389_s1] sm:$0xff] %vm109_vm6, %v108_v57  }
  0x8a   :  { %v139_v58 = vpop.permute.xlu1 %138   ;;  %v129_v59 = vpop.permute.xlu0 %128  }
  0x8b   :  { %196 = vst.msk [vmem:[%s389_s1 + $0x8] sm:$0xff] %vm130_vm7, %v139_v58   ;;  %131 = vst.msk [vmem:[%s389_s1] sm:$0xff] %vm130_vm7, %v129_v59  }
  0x8e   :  { %v160_v60 = vpop.permute.xlu1 %159   ;;  %v150_v61 = vpop.permute.xlu0 %149  }
  0x8f   :  { %201 = vst.msk [vmem:[%s389_s1 + $0x8] sm:$0xff] %vm151_vm8, %v160_v60   ;;  %152 = vst.msk [vmem:[%s389_s1] sm:$0xff] %vm151_vm8, %v150_v61  }

// kernel: net_forward.1
= control target key start
LH: loop header
LB: loop body
LE: loop exit
PB: predicated region body
PF: predicated region fallthrough
CT: control target
= control target key end

     0   :  { %vm48_vm0 = vcmask 261120   ;;  %v1380_v2 = vmov 66   ;;  %v1381_v3 = vmov 65   ;;  %v1382_v8 = vmov 0.0   ;;  %s1392_s20 = smov 48   ;;  %s1393_s21 = smov 64   ;;  %s1812_s1 = inlined_call_operand.vmem [shape: f32[32,72], index: 1, kind: input, shape index: {}]   ;;  %s1813_s0 = inlined_call_operand.vmem [shape: f32[16,32], index: 0, kind: input, shape index: {}]   ;;  %s1814_s9 = inlined_call_operand.vmem [shape: f32[128,64], index: 9, kind: input, shape index: {}]   ;;  %s1815_s2 = inlined_call_operand.vmem [shape: f32[8,64], index: 2, kind: input, shape index: {}]   ;;  %s1816_s8 = inlined_call_operand.vmem [shape: f32[16,128], index: 8, kind: input, shape index: {}]   ;;  %s1817_s10 = inlined_call_operand.vmem [shape: f32[128,8], index: 10, kind: input, shape index: {}]   ;;  %s1818_s4 = inlined_call_operand.vmem [shape: f32[64,129], index: 4, kind: input, shape index: {}]   ;;  %s1819_s3 = inlined_call_operand.vmem [shape: f32[1,64], index: 3, kind: input, shape index: {}]   ;;  %s1820_s5 = inlined_call_operand.vmem [shape: f32[1,128], index: 5, kind: input, shape index: {}]   ;;  %s1821_s7 = inlined_call_operand.vmem [shape: f32[16,16], index: 7, kind: input, shape index: {}]   ;;  %s1822_s6 = inlined_call_operand.vmem [shape: f32[1,128], index: 6, kind: input, shape index: {}]   ;;  %s1823_s11 = inlined_call_operand.vmem [shape: f32[16,128], index: 11, kind: output, shape index: {}]  }
   0x1   :  { %v47_v0 = vld [vmem:[%s1812_s1 + $0x18] sm:$0xff]  ;;  %v46_v1 = vld [vmem:[%s1812_s1 + $0x10] sm:$0xff]  ;;  %1321 = vset.pattern.permute.xlu1 %v1380_v2  ;;  %1320 = vset.pattern.permute.xlu0 %v1381_v3  ;;  %v38_v4 = vld [vmem:[%s1813_s0] sm:$0xff]  ;;  %vm1383_vm1 = vmmov 0   ;;  %vm131_vm2 = vcmask 523264   ;;  %v1384_v16 = vmov 67   ;;  %v251_v52 = vlaneseq }
   0x2   :  { %1193 = vmatprep.subr.mxu0 %v47_v0  ;;  %v45_v5 = vld [vmem:[%s1812_s1 + $0x8] sm:$0xff]  ;;  %1201 = vmatprep.mubr.msk.f32.mxu0 %vm48_vm0, %v38_v4  ;;  %v44_v6 = vld [vmem:[%s1812_s1] sm:$0xff]  ;;  %v226_v9 = vld [vmem:[%s1814_s9 + $0x78] sm:$0xff]  ;;  %v1385_v17 = vmov 68   ;;  %v1386_v23 = vmov 69   ;;  %v1387_v30 = vmov 70  }
   0x3   :  { %1194 = vmatpush3.msra.mxu0 %v47_v0  ;;  %v39_v7 = vld [vmem:[%s1813_s0 + $0x8] sm:$0xff]  ;;  %1204 = vmatprep.subr.mxu1 %v1382_v8  ;;  %v225_v11 = vld [vmem:[%s1814_s9 + $0x70] sm:$0xff]  ;;  %v130_v18 = vld [vmem:[%s1815_s2] sm:$0xff]  ;;  %v1388_v41 = vmov 71   ;;  %v1389_v49 = vmov 64   ;;  %v1583_v54 = vshrl.u32 %v251_v52, 7 }
   0x4   :  { %1195 = vmatprep.subr.mxu0 %v46_v1  ;;  %1208 = vmatprep.mubr.msk.f32.mxu1 %vm1383_vm1, %v1382_v8  ;;  %v224_v15 = vld [vmem:[%s1814_s9 + $0x68] sm:$0xff]  ;;  %v223_v19 = vld [vmem:[%s1814_s9 + $0x60] sm:$0xff]  ;;  %v222_v22 = vld [vmem:[%s1814_s9 + $0x58] sm:$0xff]  ;;  %s1391_s2 = smov 32   ;;  %s1394_s22 = smov 80   ;;  %vm411_vm3 = vcmask 130048  }
   0x5   :  { %1196 = vmatpush3.msra.mxu0 %v46_v1  ;;  %v221_v24 = vld [vmem:[%s1814_s9 + $0x50] sm:$0xff]  ;;  %v220_v26 = vld [vmem:[%s1814_s9 + $0x48] sm:$0xff]  ;;  %v219_v29 = vld [vmem:[%s1814_s9 + $0x40] sm:$0xff]  ;;  %v267_v57 = vsub.s32 1, %v1583_v54  ;;  %v281_v58 = vsub.s32 2, %v1583_v54  ;;  %s1395_s23 = smov 96  }
   0x6   :  { %1197 = vmatprep.subr.mxu0 %v45_v5  ;;  %v218_v31 = vld [vmem:[%s1814_s9 + $0x38] sm:$0xff]  ;;  %v217_v34 = vld [vmem:[%s1814_s9 + $0x30] sm:$0xff]  ;;  %v216_v35 = vld [vmem:[%s1814_s9 + $0x28] sm:$0xff]  ;;  %s1396_s24 = smov 112   ;;  %vm416_vm4 = vcmask 392192   ;;  %vm421_vm5 = vcmask 654336  }
   0x7   :  { %1198 = vmatpush3.msra.mxu0 %v45_v5  ;;  %v215_v37 = vld [vmem:[%s1814_s9 + $0x20] sm:$0xff]  ;;  %v214_v40 = vld [vmem:[%s1814_s9 + $0x18] sm:$0xff]  ;;  %v213_v42 = vld [vmem:[%s1814_s9 + $0x10] sm:$0xff]  ;;  %vm424_vm6 = vcmask 785408   ;;  %vm427_vm7 = vcmask 916480   ;;  %vm446_vm11 = vcmask 261248  }
   0x8   :  { %1199 = vmatprep.subr.mxu0 %v44_v6  ;;  %v212_v44 = vld [vmem:[%s1814_s9 + $0x8] sm:$0xff]  ;;  %v211_v46 = vld [vmem:[%s1814_s9] sm:$0xff]  ;;  %s1390_s9 = smov 16   ;;  %vm453_vm13 = vcmask 392448   ;;  %vm460_vm14 = vcmask 523648   ;;  %vm467_vm15 = vcmask 654848  }
   0x9   :  { %1200 = vmatpush3.msra.mxu0 %v44_v6 }
   0xa   :  { %1202 = vmatmul.mubr.msk.f32.vlgmr.msra.gmra.mxu0 %vm48_vm0, %v39_v7 }
  0xca   :  { %v1492_v10 = vpop.f32.mrf.mxu0 }
  0xcb   :  { %276 = vperm.xlu1 %1321, %v1492_v10   ;;  %262 = vperm.xlu0 %1320, %v1492_v10   ;;  %v532_v12 = vmul.f32 %v1492_v10, %v226_v9  ;;  %v530_v20 = vmul.f32 %v1492_v10, %v224_v15  ;;  %v528_v25 = vmul.f32 %v1492_v10, %v222_v22  ;;  %v309_v9 = vsub.s32 4, %v1583_v54 }
  0xcc   :  { %1205 = vmatpush3.xpose.msk.msra.mxu1 %vm131_vm2, %v1492_v10  ;;  %v1502_v13 = vpop.f32.mrf.mxu0  ;;  %v526_v28 = vmul.f32 %v1492_v10, %v220_v26  ;;  %v524_v33 = vmul.f32 %v1492_v10, %v218_v31  ;;  %v522_v38 = vmul.f32 %v1492_v10, %v216_v35  ;;  %v520_v43 = vmul.f32 %v1492_v10, %v214_v40 }
  0xcd   :  { %1211 = vmatprep.subr.mxu0 %v532_v12  ;;  %1206 = vmatprep.subr.mxu1 %v1382_v8  ;;  %v531_v14 = vmul.f32 %v225_v11, %v1502_v13  ;;  %v529_v21 = vmul.f32 %v223_v19, %v1502_v13  ;;  %v527_v27 = vmul.f32 %v221_v24, %v1502_v13  ;;  %v337_v19 = vsub.s32 6, %v1583_v54 }
  0xce   :  { %1212 = vmatpush3.msra.mxu0 %v532_v12  ;;  %v525_v32 = vmul.f32 %v219_v29, %v1502_v13  ;;  %v523_v36 = vmul.f32 %v217_v34, %v1502_v13  ;;  %v521_v39 = vmul.f32 %v215_v37, %v1502_v13  ;;  %v519_v45 = vmul.f32 %v213_v42, %v1502_v13 }
  0xcf   :  { %1322 = vset.pattern.permute.xlu1 %v1384_v16  ;;  %1323 = vset.pattern.permute.xlu0 %v1385_v17  ;;  %v518_v47 = vmul.f32 %v1492_v10, %v212_v44  ;;  %v517_v48 = vmul.f32 %v211_v46, %v1502_v13  ;;  %v351_v24 = vsub.s32 7, %v1583_v54 }
  0xd0   :  { %1207 = vmatpush3.xpose.msk.msra.mxu1 %vm131_vm2, %v1502_v13  ;;  %1213 = vmatprep.subr.mxu0 %v531_v14 }
  0xd1   :  { %290 = vperm.xlu1 %1322, %v1492_v10   ;;  %304 = vperm.xlu0 %1323, %v1492_v10  }
  0xd2   :  { %1214 = vmatpush3.msra.mxu0 %v531_v14  ;;  %v323_v14 = vsub.s32 5, %v1583_v54 }
  0xd3   :  { %1215 = vmatprep.subr.mxu0 %v530_v20  ;;  %1209 = vmatmul.mubr.msk.f32.vlgmr.msra.gmra.mxu1 %vm131_vm2, %v130_v18 }
  0xd4   :  { %1216 = vmatpush3.msra.mxu0 %v530_v20 }
  0xd5   :  { %1217 = vmatprep.subr.mxu0 %v529_v21  ;;  %1324 = vset.pattern.permute.xlu1 %v1386_v23 }
  0xd6   :  { %1326 = vset.pattern.permute.xlu0 %v1381_v3  ;;  %1218 = vmatpush3.msra.mxu0 %v529_v21  ;;  %v295_v3 = vsub.s32 3, %v1583_v54 }
  0xd7   :  { %318 = vperm.xlu1 %1324, %v1492_v10   ;;  %258 = vperm.xlu0 %1326, %v1502_v13  }
  0xd8   :  { %1219 = vmatprep.subr.mxu0 %v528_v25 }
  0xd9   :  { %1220 = vmatpush3.msra.mxu0 %v528_v25 }
  0xda   :  { %1221 = vmatprep.subr.mxu0 %v527_v27 }
  0xdb   :  { %1222 = vmatpush3.msra.mxu0 %v527_v27  ;;  %1325 = vset.pattern.permute.xlu1 %v1387_v30 }
  0xdc   :  { %1328 = vset.pattern.permute.xlu0 %v1384_v16  ;;  %1223 = vmatprep.subr.mxu0 %v526_v28 }
  0xdd   :  { %332 = vperm.xlu1 %1325, %v1492_v10   ;;  %286 = vperm.xlu0 %1328, %v1502_v13  }
  0xde   :  { %1224 = vmatpush3.msra.mxu0 %v526_v28 }
  0xdf   :  { %1225 = vmatprep.subr.mxu0 %v525_v32 }
  0xe0   :  { %1226 = vmatpush3.msra.mxu0 %v525_v32 }
  0xe1   :  { %1227 = vmatprep.subr.mxu0 %v524_v33  ;;  %1327 = vset.pattern.permute.xlu1 %v1380_v2 }
  0xe2   :  { %1331 = vset.pattern.permute.xlu0 %v1387_v30  ;;  %1228 = vmatpush3.msra.mxu0 %v524_v33 }
  0xe3   :  { %272 = vperm.xlu1 %1327, %v1502_v13   ;;  %328 = vperm.xlu0 %1331, %v1502_v13  }
  0xe4   :  { %1229 = vmatprep.subr.mxu0 %v523_v36 }
  0xe5   :  { %1230 = vmatpush3.msra.mxu0 %v523_v36 }
  0xe6   :  { %1231 = vmatprep.subr.mxu0 %v522_v38 }
  0xe7   :  { %1232 = vmatpush3.msra.mxu0 %v522_v38  ;;  %1329 = vset.pattern.permute.xlu1 %v1385_v17 }
  0xe8   :  { %1333 = vset.pattern.permute.xlu0 %v1388_v41  ;;  %1233 = vmatprep.subr.mxu0 %v521_v39 }
  0xe9   :  { %300 = vperm.xlu1 %1329, %v1502_v13   ;;  %346 = vperm.xlu0 %1333, %v1492_v10  }
  0xea   :  { %1234 = vmatpush3.msra.mxu0 %v521_v39 }
  0xeb   :  { %1235 = vmatprep.subr.mxu0 %v520_v43 }
  0xec   :  { %1236 = vmatpush3.msra.mxu0 %v520_v43 }
  0xed   :  { %1237 = vmatprep.subr.mxu0 %v519_v45  ;;  %1330 = vset.pattern.permute.xlu1 %v1386_v23 }
  0xee   :  { %1238 = vmatpush3.msra.mxu0 %v519_v45  ;;  %314 = vperm.xlu1 %1330, %v1502_v13  }
  0xef   :  { %1239 = vmatprep.subr.mxu0 %v518_v47 }
  0xf0   :  { %1240 = vmatpush3.msra.mxu0 %v518_v47 }
  0xf1   :  { %1241 = vmatprep.subr.mxu0 %v517_v48 }
  0xf2   :  { %1242 = vmatpush3.msra.mxu0 %v517_v48  ;;  %1332 = vset.pattern.permute.xlu1 %v1388_v41  ;;  %v253_v41 = vsub.s32 0, %v1583_v54 }
  0xf3   :  { %342 = vperm.xlu1 %1332, %v1502_v13  }
  0xf7   :  { %1334 = vset.pattern.permute.xlu1 %v1389_v49 }
  0xf8   :  { %248 = vperm.xlu1 %1334, %v1492_v10  }
  0xfc   :  { %244 = vperm.xlu1 %1334, %v1502_v13  }
 0x146   :  { %v277_v50 = vpop.permute.xlu1 %276  ;;  %v263_v53 = vpop.permute.xlu0 %262 }
 0x14c   :  { %v291_v51 = vpop.permute.xlu1 %290  ;;  %v305_v56 = vpop.permute.xlu0 %304 }
 0x152   :  { %v319_v55 = vpop.permute.xlu1 %318  ;;  %v259_v62 = vpop.permute.xlu0 %258 }
 0x158   :  { %v333_v59 = vpop.permute.xlu1 %332  ;;  %v287_v10 = vpop.permute.xlu0 %286 }
 0x15e   :  { %v273_v4 = vpop.permute.xlu1 %272  ;;  %v329_v25 = vpop.permute.xlu0 %328 }
 0x164   :  { %v301_v15 = vpop.permute.xlu1 %300  ;;  %v347_v29 = vpop.permute.xlu0 %346 }
 0x169   :  { %v315_v20 = vpop.permute.xlu1 %314 }
 0x16e   :  { %v343_v30 = vpop.permute.xlu1 %342 }
 0x173   :  { %v249_v33 = vpop.permute.xlu1 %248 }
 0x177   :  { %v245_v34 = vpop.permute.xlu1 %244 }
 0x193   :  { %v1587_v60 = vpop.f32.mrf.mxu1 }
 0x194   :  { %v268_v61 = vrot.slane %v1587_v60, %v267_v57  ;;  %v282_v2 = vrot.slane %v1587_v60, %v281_v58  ;;  %v296_v7 = vrot.slane %v1587_v60, %v295_v3  ;;  %v310_v13 = vrot.slane %v1587_v60, %v309_v9  ;;  %v1625_v3 = vld [vmem:[%s1816_s8 + $0x8] sm:$0xff] }
 0x195   :  { %v1210_v63 = vpop.f32.mrf.mxu1  ;;  %v324_v18 = vrot.slane %v1587_v60, %v323_v14  ;;  %v338_v23 = vrot.slane %v1587_v60, %v337_v19  ;;  %v352_v28 = vrot.slane %v1587_v60, %v351_v24  ;;  %v254_v44 = vrot.slane %v1587_v60, %v253_v41  ;;  %v1616_v60 = vld [vmem:[%s1816_s8] sm:$0xff] }
 0x196   :  { %v270_v0 = vadd.f32 %v268_v61, %v263_v53  ;;  %v269_v1 = vadd.f32 %v268_v61, %v259_v62  ;;  %v284_v5 = vadd.f32 %v282_v2, %v277_v50  ;;  %v283_v6 = vadd.f32 %v282_v2, %v273_v4 }
 0x197   :  { %v298_v11 = vadd.f32 %v296_v7, %v291_v51  ;;  %v297_v12 = vadd.f32 %v296_v7, %v287_v10  ;;  %v312_v16 = vadd.f32 %v310_v13, %v305_v56  ;;  %v311_v17 = vadd.f32 %v310_v13, %v301_v15 }
 0x198   :  { %359 = vrot.lane.b32.xlu1 %v270_v0, %s1390_s9  ;;  %357 = vrot.lane.b32.xlu0 %v269_v1, %s1390_s9  ;;  %v326_v21 = vadd.f32 %v324_v18, %v319_v55  ;;  %v325_v22 = vadd.f32 %v324_v18, %v315_v20  ;;  %v340_v26 = vadd.f32 %v338_v23, %v333_v59  ;;  %vm436_vm8 = vcmp.gt.f32.partialorder %v1616_v60, 0.0 }
 0x199   :  { %v339_v27 = vadd.f32 %v338_v23, %v329_v25  ;;  %v354_v31 = vadd.f32 %v352_v28, %v347_v29  ;;  %v353_v32 = vadd.f32 %v352_v28, %v343_v30  ;;  %v256_v47 = vadd.f32 %v254_v44, %v249_v33  ;;  %v242_v29 = vld [vmem:[%s1817_s10 + $0x78] sm:$0xff]  ;;  %v241_v30 = vld [vmem:[%s1817_s10 + $0x70] sm:$0xff] }
 0x19a   :  { %v255_v48 = vadd.f32 %v254_v44, %v245_v34  ;;  %vm437_vm12 = vcmp.gt.f32.partialorder %v1625_v3, 0.0  ;;  %1246 = vmatprep.subr.mxu1 %v242_v29  ;;  %v238_v33 = vld [vmem:[%s1817_s10 + $0x58] sm:$0xff]  ;;  %v237_v34 = vld [vmem:[%s1817_s10 + $0x50] sm:$0xff]  ;;  %v228_v44 = vld [vmem:[%s1817_s10 + $0x8] sm:$0xff] }
 0x19b   :  { %1247 = vmatpush3.msra.mxu1 %v242_v29  ;;  %v1400_v29 = vmov 2  }
 0x19c   :  { %367 = vrot.lane.b32.xlu1 %v284_v5, %s1391_s2  ;;  %365 = vrot.lane.b32.xlu0 %v283_v6, %s1391_s2 }
 0x19d   :  { %1248 = vmatprep.subr.mxu1 %v241_v30 }
 0x19e   :  { %1249 = vmatpush3.msra.mxu1 %v241_v30  ;;  %v1401_v30 = vmov 5  }
 0x1a0   :  { %375 = vrot.lane.b32.xlu1 %v298_v11, %s1392_s20  ;;  %373 = vrot.lane.b32.xlu0 %v297_v12, %s1392_s20 }
 0x1a4   :  { %383 = vrot.lane.b32.xlu1 %v312_v16, %s1393_s21  ;;  %381 = vrot.lane.b32.xlu0 %v311_v17, %s1393_s21 }
 0x1a8   :  { %391 = vrot.lane.b32.xlu1 %v326_v21, %s1394_s22  ;;  %389 = vrot.lane.b32.xlu0 %v325_v22, %s1394_s22 }
 0x1ac   :  { %399 = vrot.lane.b32.xlu1 %v340_v26, %s1395_s23  ;;  %397 = vrot.lane.b32.xlu0 %v339_v27, %s1395_s23 }
 0x1b0   :  { %407 = vrot.lane.b32.xlu1 %v354_v31, %s1396_s24  ;;  %405 = vrot.lane.b32.xlu0 %v353_v32, %s1396_s24  ;;  %v240_v31 = vld [vmem:[%s1817_s10 + $0x68] sm:$0xff]  ;;  %v239_v32 = vld [vmem:[%s1817_s10 + $0x60] sm:$0xff] }
 0x1b1   :  { %1250 = vmatprep.subr.mxu1 %v240_v31 }
 0x1b2   :  { %1251 = vmatpush3.msra.mxu1 %v240_v31  ;;  %v1402_v31 = vmov 4  }
 0x1b3   :  { %1252 = vmatprep.subr.mxu1 %v239_v32 }
 0x1b4   :  { %1253 = vmatpush3.msra.mxu1 %v239_v32  ;;  %v1403_v32 = vmov 6  }
 0x1b5   :  { %1254 = vmatprep.subr.mxu1 %v238_v33 }
 0x1b6   :  { %1255 = vmatpush3.msra.mxu1 %v238_v33  ;;  %v1404_v33 = vmov 7  }
 0x1b7   :  { %1256 = vmatprep.subr.mxu1 %v237_v34 }
 0x1b8   :  { %1257 = vmatpush3.msra.mxu1 %v237_v34  ;;  %v807_v34 = vld [vmem:[%s1818_s4 + $0x78] sm:$0xff] }
 0x1b9   :  { %830 = vmatprep.subr.mxu0 %v807_v34 }
 0x20a   :  { %v360_v35 = vpop.permute.xlu1 %359  ;;  %v358_v36 = vpop.permute.xlu0 %357 }
 0x20b   :  { %v413_v49 = vsel %vm411_vm3, %v256_v47, %v360_v35  ;;  %v412_v50 = vsel %vm411_vm3, %v255_v48, %v358_v36  ;;  %v236_v35 = vld [vmem:[%s1817_s10 + $0x48] sm:$0xff]  ;;  %v235_v36 = vld [vmem:[%s1817_s10 + $0x40] sm:$0xff] }
 0x20c   :  { %1258 = vmatprep.subr.mxu1 %v236_v35 }
 0x20d   :  { %1259 = vmatpush3.msra.mxu1 %v236_v35  ;;  %v806_v35 = vld [vmem:[%s1818_s4 + $0x70] sm:$0xff] }
 0x20e   :  { %v368_v37 = vpop.permute.xlu1 %367  ;;  %v366_v38 = vpop.permute.xlu0 %365  ;;  %1260 = vmatprep.subr.mxu1 %v235_v36 }
 0x20f   :  { %v415_v51 = vsel %vm48_vm0, %v413_v49, %v368_v37  ;;  %v414_v52 = vsel %vm48_vm0, %v412_v50, %v366_v38  ;;  %v234_v37 = vld [vmem:[%s1817_s10 + $0x38] sm:$0xff]  ;;  %1261 = vmatpush3.msra.mxu1 %v235_v36  ;;  %v233_v38 = vld [vmem:[%s1817_s10 + $0x30] sm:$0xff]  ;;  %v805_v36 = vld [vmem:[%s1818_s4 + $0x68] sm:$0xff] }
 0x210   :  { %1262 = vmatprep.subr.mxu1 %v234_v37 }
 0x211   :  { %1263 = vmatpush3.msra.mxu1 %v234_v37  ;;  %v804_v37 = vld [vmem:[%s1818_s4 + $0x60] sm:$0xff] }
 0x212   :  { %v376_v39 = vpop.permute.xlu1 %375  ;;  %v374_v40 = vpop.permute.xlu0 %373  ;;  %1264 = vmatprep.subr.mxu1 %v233_v38 }
 0x213   :  { %v418_v56 = vsel %vm416_vm4, %v415_v51, %v376_v39  ;;  %v417_v57 = vsel %vm416_vm4, %v414_v52, %v374_v40  ;;  %v232_v39 = vld [vmem:[%s1817_s10 + $0x28] sm:$0xff]  ;;  %1265 = vmatpush3.msra.mxu1 %v233_v38  ;;  %v231_v40 = vld [vmem:[%s1817_s10 + $0x20] sm:$0xff]  ;;  %v803_v38 = vld [vmem:[%s1818_s4 + $0x58] sm:$0xff] }
 0x214   :  { %1266 = vmatprep.subr.mxu1 %v232_v39 }
 0x215   :  { %1267 = vmatpush3.msra.mxu1 %v232_v39  ;;  %v802_v39 = vld [vmem:[%s1818_s4 + $0x50] sm:$0xff] }
 0x216   :  { %v384_v42 = vpop.permute.xlu1 %383  ;;  %v382_v43 = vpop.permute.xlu0 %381  ;;  %1268 = vmatprep.subr.mxu1 %v231_v40 }
 0x217   :  { %v420_v58 = vsel %vm131_vm2, %v418_v56, %v384_v42  ;;  %v419_v59 = vsel %vm131_vm2, %v417_v57, %v382_v43  ;;  %v230_v42 = vld [vmem:[%s1817_s10 + $0x18] sm:$0xff]  ;;  %1269 = vmatpush3.msra.mxu1 %v231_v40  ;;  %v229_v43 = vld [vmem:[%s1817_s10 + $0x10] sm:$0xff]  ;;  %v801_v40 = vld [vmem:[%s1818_s4 + $0x48] sm:$0xff] }
 0x218   :  { %1270 = vmatprep.subr.mxu1 %v230_v42 }
 0x219   :  { %1271 = vmatpush3.msra.mxu1 %v230_v42  ;;  %v800_v42 = vld [vmem:[%s1818_s4 + $0x40] sm:$0xff] }
 0x21a   :  { %v392_v45 = vpop.permute.xlu1 %391  ;;  %v390_v46 = vpop.permute.xlu0 %389  ;;  %1272 = vmatprep.subr.mxu1 %v229_v43 }
 0x21b   :  { %v423_v61 = vsel %vm421_vm5, %v420_v58, %v392_v45  ;;  %v422_v62 = vsel %vm421_vm5, %v419_v59, %v390_v46  ;;  %1273 = vmatpush3.msra.mxu1 %v229_v43  ;;  %v227_v45 = vld [vmem:[%s1817_s10] sm:$0xff]  ;;  %v799_v43 = vld [vmem:[%s1818_s4 + $0x38] sm:$0xff] }
 0x21c   :  { %1274 = vmatprep.subr.mxu1 %v228_v44 }
 0x21d   :  { %1275 = vmatpush3.msra.mxu1 %v228_v44  ;;  %v798_v44 = vld [vmem:[%s1818_s4 + $0x30] sm:$0xff] }
 0x21e   :  { %v400_v53 = vpop.permute.xlu1 %399  ;;  %v398_v55 = vpop.permute.xlu0 %397  ;;  %1276 = vmatprep.subr.mxu1 %v227_v45 }
 0x21f   :  { %v426_v63 = vsel %vm424_vm6, %v423_v61, %v400_v53  ;;  %v425_v0 = vsel %vm424_vm6, %v422_v62, %v398_v55  ;;  %1277 = vmatpush3.msra.mxu1 %v227_v45  ;;  %v797_v45 = vld [vmem:[%s1818_s4 + $0x28] sm:$0xff] }
 0x220   :  { %1281 = vmatprep.subr.mxu1 %v1382_v8 }
 0x222   :  { %v408_v1 = vpop.permute.xlu1 %407  ;;  %v406_v2 = vpop.permute.xlu0 %405 }
 0x223   :  { %v429_v4 = vsel %vm427_vm7, %v426_v63, %v408_v1  ;;  %v428_v5 = vsel %vm427_vm7, %v425_v0, %v406_v2 }
 0x224   :  { %vm431_vm9 = vcmp.gt.f32.partialorder %v429_v4, 0.0  ;;  %v433_v6 = vmul.f32 0.2, %v429_v4  ;;  %vm430_vm10 = vcmp.gt.f32.partialorder %v428_v5, 0.0  ;;  %v432_v7 = vmul.f32 0.2, %v428_v5 }
 0x226   :  { %v435_v9 = vsel %vm431_vm9, %v429_v4, %v433_v6  ;;  %v434_v10 = vsel %vm430_vm10, %v428_v5, %v432_v7  ;;  %vm481_vm9 = vcmask 917248   ;;  %vm488_vm10 = vcmask 1048448  }
 0x227   :  { %v1631_v11 = vsel %vm436_vm8, %v434_v10, -1e+30  ;;  %v1637_v14 = vsel %vm437_vm12, %v435_v9, -1e+30  ;;  %vm474_vm8 = vcmask 786048  }
 0x228   :  { %v447_v12 = vsel %vm446_vm11, %v1631_v11, -inf  ;;  %v440_v13 = vsel %vm411_vm3, %v1631_v11, -inf  ;;  %v454_v15 = vsel %vm453_vm13, %v1631_v11, -inf  ;;  %v443_v16 = vsel %vm411_vm3, %v1637_v14, -inf }
 0x229   :  { %448 = vmax.xlane.f32.xlu1 %v447_v12  ;;  %441 = vmax.xlane.f32.xlu0 %v440_v13  ;;  %v461_v17 = vsel %vm460_vm14, %v1631_v11, -inf  ;;  %v450_v18 = vsel %vm446_vm11, %v1637_v14, -inf  ;;  %v468_v19 = vsel %vm467_vm15, %v1631_v11, -inf  ;;  %v457_v20 = vsel %vm453_vm13, %v1637_v14, -inf }
 0x22a   :  { %v475_v21 = vsel %vm474_vm8, %v1631_v11, -inf  ;;  %v464_v22 = vsel %vm460_vm14, %v1637_v14, -inf  ;;  %v482_v23 = vsel %vm481_vm9, %v1631_v11, -inf  ;;  %v471_v24 = vsel %vm467_vm15, %v1637_v14, -inf }
 0x22b   :  { %v489_v25 = vsel %vm488_vm10, %v1631_v11, -inf  ;;  %v478_v26 = vsel %vm474_vm8, %v1637_v14, -inf  ;;  %v485_v27 = vsel %vm481_vm9, %v1637_v14, -inf  ;;  %v492_v28 = vsel %vm488_vm10, %v1637_v14, -inf }
 0x22d   :  { %455 = vmax.xlane.f32.xlu1 %v454_v15  ;;  %444 = vmax.xlane.f32.xlu0 %v443_v16 }
 0x231   :  { %462 = vmax.xlane.f32.xlu1 %v461_v17  ;;  %451 = vmax.xlane.f32.xlu0 %v450_v18 }
 0x235   :  { %469 = vmax.xlane.f32.xlu1 %v468_v19  ;;  %458 = vmax.xlane.f32.xlu0 %v457_v20 }
 0x239   :  { %476 = vmax.xlane.f32.xlu1 %v475_v21  ;;  %465 = vmax.xlane.f32.xlu0 %v464_v22 }
 0x23d   :  { %483 = vmax.xlane.f32.xlu1 %v482_v23  ;;  %472 = vmax.xlane.f32.xlu0 %v471_v24 }
 0x241   :  { %490 = vmax.xlane.f32.xlu1 %v489_v25  ;;  %479 = vmax.xlane.f32.xlu0 %v478_v26  ;;  %v1397_v25 = vmov 0  }
 0x242   :  { %1335 = vset.pattern.permute.xlu1 %v1397_v25 }
 0x245   :  { %486 = vmax.xlane.f32.xlu0 %v485_v27 }
 0x249   :  { %493 = vmax.xlane.f32.xlu0 %v492_v28 }
 0x2b2   :  { %v449_v46 = vpop.xlane.xlu1 %448  ;;  %v442_v47 = vpop.xlane.xlu0 %441 }
 0x2b3   :  { %v495_v57 = vsel %vm411_vm3, %v442_v47, %v449_v46  ;;  %v796_v46 = vld [vmem:[%s1818_s4 + $0x20] sm:$0xff]  ;;  %v795_v47 = vld [vmem:[%s1818_s4 + $0x18] sm:$0xff] }
 0x2b6   :  { %v456_v48 = vpop.xlane.xlu1 %455  ;;  %v445_v49 = vpop.xlane.xlu0 %444 }
 0x2b7   :  { %v497_v58 = vsel %vm48_vm0, %v495_v57, %v456_v48  ;;  %v794_v48 = vld [vmem:[%s1818_s4 + $0x10] sm:$0xff] }
 0x2ba   :  { %v463_v50 = vpop.xlane.xlu1 %462  ;;  %v452_v51 = vpop.xlane.xlu0 %451 }
 0x2bb   :  { %v499_v62 = vsel %vm416_vm4, %v497_v58, %v463_v50  ;;  %v496_v7 = vsel %vm411_vm3, %v445_v49, %v452_v51  ;;  %v793_v49 = vld [vmem:[%s1818_s4 + $0x8] sm:$0xff]  ;;  %v792_v50 = vld [vmem:[%s1818_s4] sm:$0xff] }
 0x2be   :  { %v470_v52 = vpop.xlane.xlu1 %469  ;;  %v459_v53 = vpop.xlane.xlu0 %458 }
 0x2bf   :  { %v501_v63 = vsel %vm131_vm2, %v499_v62, %v470_v52  ;;  %v498_v9 = vsel %vm48_vm0, %v496_v7, %v459_v53 }
 0x2c2   :  { %v477_v55 = vpop.xlane.xlu1 %476  ;;  %v466_v56 = vpop.xlane.xlu0 %465 }
 0x2c3   :  { %v503_v0 = vsel %vm421_vm5, %v501_v63, %v477_v55  ;;  %v500_v13 = vsel %vm416_vm4, %v498_v9, %v466_v56 }
 0x2c6   :  { %v484_v59 = vpop.xlane.xlu1 %483  ;;  %v473_v61 = vpop.xlane.xlu0 %472 }
 0x2c7   :  { %v505_v1 = vsel %vm424_vm6, %v503_v0, %v484_v59  ;;  %v502_v15 = vsel %vm131_vm2, %v500_v13, %v473_v61 }
 0x2ca   :  { %v491_v2 = vpop.xlane.xlu1 %490  ;;  %v480_v4 = vpop.xlane.xlu0 %479 }
 0x2cb   :  { %v507_v5 = vsel %vm427_vm7, %v505_v1, %v491_v2  ;;  %v504_v16 = vsel %vm421_vm5, %v502_v15, %v480_v4  ;;  %vm756_vm5 = vcmask 195584  }
 0x2cc   :  { %v509_v6 = vsub.f32 %v1631_v11, %v507_v5 }
 0x2ce   :  { %v511_v10 = vmul.f32 1.442695, %v509_v6  ;;  %v487_v12 = vpop.xlane.xlu0 %486 }
 0x2cf   :  { %v506_v17 = vsel %vm424_vm6, %v504_v16, %v487_v12  ;;  %vm761_vm6 = vcmask 326656  }
 0x2d0   :  { %1352 = vpow2.f32 %v511_v10 }
 0x2d2   :  { %v494_v18 = vpop.xlane.xlu0 %493 }
 0x2d3   :  { %v508_v19 = vsel %vm427_vm7, %v506_v17, %v494_v18  ;;  %vm766_vm7 = vcmask 457728  }
 0x2d4   :  { %v510_v11 = vsub.f32 %v1637_v14, %v508_v19  ;;  %v1398_v14 = vmov 3   ;;  %v1133_v19 = vld [vmem:[%s1819_s3] ss:$0 sm:$0xff] }
 0x2d5   :  { %1338 = vset.pattern.permute.xlu0 %v1398_v14 }
 0x2d6   :  { %v513_v20 = vmul.f32 1.442695, %v510_v11 }
 0x2d8   :  { %1354 = vpow2.f32 %v513_v20 }
 0x2dd   :  { %v1353_v21 = vpop.eup %1352 }
 0x2de   :  { %v515_v22 = vmul.f32 %v1353_v21, %v1616_v60 }
 0x2e0   :  { %1243 = vmatprep.mubr.f32.mxu0 %v515_v22  ;;  %1278 = vmatprep.mubr.f32.mxu1 %v515_v22 }
 0x2e5   :  { %v1355_v23 = vpop.eup %1354 }
 0x2e6   :  { %v516_v24 = vmul.f32 %v1355_v23, %v1625_v3  ;;  %v1399_v3 = vmov 1  }
 0x2e8   :  { %1244 = vmatmul.mubr.f32.vlgmr.msra.gmra.mxu0 %v516_v24  ;;  %1279 = vmatmul.mubr.f32.vlgmr.msra.gmra.mxu1 %v516_v24 }
 0x2e9   :  { %878 = vmatprep.mubr.f32.mxu0 %v1382_v8  ;;  %1285 = vmatprep.mubr.msk.f32.mxu1 %vm1383_vm1, %v1382_v8  ;;  %vm751_vm1 = vcmask 64512  }
 0x2ea   :  { %831 = vmatpush1.msra.mxu0 %v806_v35 }
 0x2eb   :  { %832 = vmatprep.subr.mxu0 %v805_v36 }
 0x2ec   :  { %833 = vmatpush1.msra.mxu0 %v804_v37 }
 0x2ed   :  { %834 = vmatprep.subr.mxu0 %v803_v38 }
 0x2ee   :  { %835 = vmatpush1.msra.mxu0 %v802_v39 }
 0x2ef   :  { %836 = vmatprep.subr.mxu0 %v801_v40  ;;  %v891_v40 = vld [vmem:[%s1820_s5] sm:$0x1] }
 0x2f0   :  { %837 = vmatpush1.msra.mxu0 %v800_v42 }
 0x2f1   :  { %838 = vmatprep.subr.mxu0 %v799_v43 }
 0x2f2   :  { %839 = vmatpush1.msra.mxu0 %v798_v44 }
 0x2f3   :  { %840 = vmatprep.subr.mxu0 %v797_v45  ;;  %v41_v45 = vld [vmem:[%s1821_s7 + $0x8] sm:$0xff] }
 0x2f4   :  { %841 = vmatpush1.msra.mxu0 %v796_v46  ;;  %vm985_vm11 = vcmp.gt.f32.partialorder %v41_v45, 0.0 }
 0x2f5   :  { %842 = vmatprep.subr.mxu0 %v795_v47 }
 0x2f6   :  { %843 = vmatpush1.msra.mxu0 %v794_v48 }
 0x2f7   :  { %844 = vmatprep.subr.mxu0 %v793_v49 }
 0x2f8   :  { %845 = vmatpush1.msra.mxu0 %v792_v50 }
 0x3a8   :  { %v1280_v26 = vpop.f32.mrf.mxu1  ;;  %v1245_v7 = vpop.f32.mrf.mxu0 }
 0x3a9   :  { %1356 = vrcp.f32 %v1280_v26 }
 0x3aa   :  { %v674_v27 = vpop.f32.mrf.mxu1  ;;  %v599_v18 = vpop.f32.mrf.mxu0 }
 0x3ab   :  { %1358 = vrcp.f32 %v674_v27 }
 0x3b6   :  { %v1357_v60 = vpop.eup %1356 }
 0x3b7   :  { %716 = vperm.xlu0 %1338, %v1357_v60   ;;  %692 = vperm.xlu1 %1335, %v1357_v60  }
 0x3b8   :  { %v1359_v28 = vpop.eup %1358 }
 0x3bb   :  { %1341 = vset.pattern.permute.xlu0 %v1399_v3  ;;  %1336 = vset.pattern.permute.xlu1 %v1399_v3 }
 0x3bc   :  { %700 = vperm.xlu1 %1336, %v1357_v60   ;;  %696 = vperm.xlu0 %1341, %v1359_v28  }
 0x3c0   :  { %1337 = vset.pattern.permute.xlu1 %v1400_v29  ;;  %1342 = vset.pattern.permute.xlu0 %v1401_v30 }
 0x3c1   :  { %708 = vperm.xlu1 %1337, %v1357_v60   ;;  %732 = vperm.xlu0 %1342, %v1357_v60  }
 0x3c5   :  { %1339 = vset.pattern.permute.xlu1 %v1402_v31  ;;  %1350 = vset.pattern.permute.xlu0 %v1397_v25 }
 0x3c6   :  { %724 = vperm.xlu1 %1339, %v1357_v60  }
 0x3ca   :  { %1340 = vset.pattern.permute.xlu1 %v1397_v25 }
 0x3cb   :  { %687 = vperm.xlu1 %1340, %v1359_v28  }
 0x3cf   :  { %1343 = vset.pattern.permute.xlu1 %v1403_v32 }
 0x3d0   :  { %740 = vperm.xlu1 %1343, %v1357_v60  }
 0x3d4   :  { %1344 = vset.pattern.permute.xlu1 %v1400_v29 }
 0x3d5   :  { %704 = vperm.xlu1 %1344, %v1359_v28  }
 0x3d9   :  { %1345 = vset.pattern.permute.xlu1 %v1398_v14 }
 0x3da   :  { %712 = vperm.xlu1 %1345, %v1359_v28  }
 0x3de   :  { %1346 = vset.pattern.permute.xlu1 %v1402_v31 }
 0x3df   :  { %720 = vperm.xlu1 %1346, %v1359_v28  }
 0x3e3   :  { %1347 = vset.pattern.permute.xlu1 %v1401_v30 }
 0x3e4   :  { %728 = vperm.xlu1 %1347, %v1359_v28  }
 0x3e8   :  { %1348 = vset.pattern.permute.xlu1 %v1403_v32 }
 0x3e9   :  { %736 = vperm.xlu1 %1348, %v1359_v28  }
 0x3ed   :  { %1349 = vset.pattern.permute.xlu1 %v1404_v33 }
 0x3ee   :  { %744 = vperm.xlu1 %1349, %v1359_v28  }
 0x3f2   :  { %748 = vperm.xlu1 %1349, %v1357_v60  }
 0x3f6   :  { %1351 = vset.pattern.permute.xlu1 %v1397_v25 }
 0x432   :  { %v693_v51 = vpop.permute.xlu1 %692  ;;  %v717_v62 = vpop.permute.xlu0 %716 }
 0x437   :  { %v701_v52 = vpop.permute.xlu1 %700  ;;  %v697_v0 = vpop.permute.xlu0 %696 }
 0x438   :  { %v753_v1 = vsel %vm751_vm1, %v693_v51, %v701_v52 }
 0x43c   :  { %v709_v53 = vpop.permute.xlu1 %708  ;;  %v733_v20 = vpop.permute.xlu0 %732 }
 0x43d   :  { %v755_v5 = vsel %vm411_vm3, %v753_v1, %v709_v53 }
 0x43e   :  { %v758_v12 = vsel %vm756_vm5, %v755_v5, %v717_v62 }
 0x441   :  { %v725_v55 = vpop.permute.xlu1 %724 }
 0x442   :  { %v760_v15 = vsel %vm48_vm0, %v758_v12, %v725_v55 }
 0x443   :  { %v763_v22 = vsel %vm761_vm6, %v760_v15, %v733_v20 }
 0x446   :  { %v688_v56 = vpop.permute.xlu1 %687 }
 0x447   :  { %v752_v2 = vsel %vm751_vm1, %v688_v56, %v697_v0 }
 0x44b   :  { %v741_v57 = vpop.permute.xlu1 %740 }
 0x44c   :  { %v765_v23 = vsel %vm416_vm4, %v763_v22, %v741_v57 }
 0x450   :  { %v705_v58 = vpop.permute.xlu1 %704 }
 0x451   :  { %v754_v6 = vsel %vm411_vm3, %v752_v2, %v705_v58 }
 0x455   :  { %v713_v59 = vpop.permute.xlu1 %712 }
 0x456   :  { %v757_v9 = vsel %vm756_vm5, %v754_v6, %v713_v59 }
 0x45a   :  { %v721_v61 = vpop.permute.xlu1 %720 }
 0x45b   :  { %v759_v10 = vsel %vm48_vm0, %v757_v9, %v721_v61 }
 0x45f   :  { %v729_v63 = vpop.permute.xlu1 %728 }
 0x460   :  { %v762_v13 = vsel %vm761_vm6, %v759_v10, %v729_v63 }
 0x464   :  { %v737_v4 = vpop.permute.xlu1 %736 }
 0x465   :  { %v764_v16 = vsel %vm416_vm4, %v762_v13, %v737_v4  ;;  %v1140_v13 = vld [vmem:[%s1822_s6] ss:$0 sm:$0xff] }
 0x469   :  { %v745_v17 = vpop.permute.xlu1 %744 }
 0x46a   :  { %v767_v11 = vsel %vm766_vm7, %v764_v16, %v745_v17 }
 0x46b   :  { %v769_v21 = vmul.f32 %v767_v11, %v599_v18 }
 0x46d   :  { %v778_v24 = vadd.f32 %v1133_v19, %v769_v21  ;;  %v749_v25 = vpop.permute.xlu1 %748 }
 0x46e   :  { %v768_v14 = vsel %vm766_vm7, %v765_v23, %v749_v25 }
 0x46f   :  { %v782_v26 = vmin.f32 %v778_v24, 0.0  ;;  %v770_v27 = vmul.f32 %v1245_v7, %v768_v14  ;;  %vm780_vm0 = vcmp.gt.f32.partialorder %v778_v24, 0.0 }
 0x471   :  { %v784_v60 = vmul.f32 1.442695, %v782_v26  ;;  %v779_v28 = vadd.f32 %v1133_v19, %v770_v27 }
 0x473   :  { %1360 = vpow2.f32 %v784_v60  ;;  %v783_v3 = vmin.f32 %v779_v28, 0.0  ;;  %vm781_vm4 = vcmp.gt.f32.partialorder %v779_v28, 0.0 }
 0x475   :  { %v786_v29 = vmul.f32 1.442695, %v783_v3 }
 0x477   :  { %1362 = vpow2.f32 %v786_v29 }
 0x480   :  { %v1361_v30 = vpop.eup %1360 }
 0x481   :  { %v1134_v31 = vadd.f32 -1.0, %v1361_v30 }
 0x483   :  { %v790_v32 = vsel %vm780_vm0, %v778_v24, %v1134_v31 }
 0x484   :  { %v1363_v33 = vpop.eup %1362  ;;  %1136 = vmatmul.mubr.msk.f32.vlgmr.msra.gmra.mxu0 %vm131_vm2, %v790_v32 }
 0x485   :  { %884 = vmatprep.mubr.f32.mxu0 %v1382_v8  ;;  %v1135_v34 = vadd.f32 -1.0, %v1363_v33 }
 0x487   :  { %v791_v35 = vsel %vm781_vm4, %v779_v28, %v1135_v34 }
 0x488   :  { %1137 = vmatmul.mubr.msk.f32.gmra.mxu0 %vm131_vm2, %v791_v35 }
 0x544   :  { %v880_v36 = vpop.f32.mrf.mxu0 }
 0x546   :  { %v882_v37 = vpop.f32.mrf.mxu0 }
 0x547   :  { %964 = vperm.xlu0 %1350, %v882_v37  }
 0x548   :  { %v886_v38 = vpop.f32.mrf.mxu0 }
 0x549   :  { %1282 = vmatpush3.xpose.msra.mxu1 %v886_v38 }
 0x54a   :  { %v888_v39 = vpop.f32.mrf.mxu0  ;;  %1283 = vmatprep.subr.mxu1 %v1382_v8  ;;  %v40_v8 = vld [vmem:[%s1821_s7] sm:$0xff] }
 0x54b   :  { %969 = vperm.xlu1 %1351, %v888_v39   ;;  %vm984_vm2 = vcmp.gt.f32.partialorder %v40_v8, 0.0 }
 0x54d   :  { %1284 = vmatpush3.xpose.msra.mxu1 %v880_v36 }
 0x54e   :  { %1288 = vmatprep.subr.mxu1 %v886_v38 }
 0x550   :  { %1286 = vmatmul.mubr.f32.vlgmr.msra.gmra.mxu1 %v891_v40 }
 0x551   :  { %1289 = vmatpush3.msra.mxu1 %v886_v38 }
 0x552   :  { %1290 = vmatprep.subr.mxu1 %v880_v36 }
 0x553   :  { %1291 = vmatpush3.msra.mxu1 %v880_v36 }
 0x5c2   :  { %v965_v43 = vpop.permute.xlu0 %964 }
 0x5c6   :  { %v970_v46 = vpop.permute.xlu1 %969 }
 0x610   :  { %v958_v42 = vpop.f32.mrf.mxu1 }
 0x611   :  { %v975_v44 = vrot.slane %v958_v42, %v253_v41 }
 0x612   :  { %v1287_v47 = vpop.f32.mrf.mxu1 }
 0x613   :  { %v976_v48 = vadd.f32 %v975_v44, %v965_v43  ;;  %v977_v49 = vadd.f32 %v975_v44, %v970_v46 }
 0x615   :  { %vm978_vm12 = vcmp.gt.f32.partialorder %v976_v48, 0.0  ;;  %v980_v50 = vmul.f32 0.2, %v976_v48  ;;  %vm979_vm13 = vcmp.gt.f32.partialorder %v977_v49, 0.0  ;;  %v981_v51 = vmul.f32 0.2, %v977_v49 }
 0x617   :  { %v982_v54 = vsel %vm978_vm12, %v976_v48, %v980_v50  ;;  %v983_v41 = vsel %vm979_vm13, %v977_v49, %v981_v51 }
 0x618   :  { %v986_v52 = vsel %vm984_vm2, %v982_v54, -1e+30  ;;  %v987_v53 = vsel %vm985_vm11, %v983_v41, -1e+30 }
 0x619   :  { %v988_v55 = vsel %vm411_vm3, %v986_v52, -inf  ;;  %v991_v56 = vsel %vm411_vm3, %v987_v53, -inf }
 0x61a   :  { %989 = vmax.xlane.f32.xlu1 %v988_v55  ;;  %992 = vmax.xlane.f32.xlu0 %v991_v56 }
 0x6a3   :  { %v993_v57 = vpop.xlane.xlu0 %992  ;;  %v990_v58 = vpop.xlane.xlu1 %989 }
 0x6a4   :  { %v995_v59 = vsub.f32 %v987_v53, %v993_v57  ;;  %v994_v61 = vsub.f32 %v986_v52, %v990_v58 }
 0x6a6   :  { %v998_v62 = vmul.f32 1.442695, %v995_v59  ;;  %v996_v63 = vmul.f32 1.442695, %v994_v61 }
 0x6a8   :  { %1364 = vpow2.f32 %v998_v62 }
 0x6a9   :  { %1366 = vpow2.f32 %v996_v63 }
 0x6b5   :  { %v1365_v0 = vpop.eup %1364 }
 0x6b6   :  { %v1367_v1 = vpop.eup %1366  ;;  %v1001_v2 = vmul.f32 %v1365_v0, %v41_v45 }
 0x6b7   :  { %v1000_v4 = vmul.f32 %v1367_v1, %v40_v8 }
 0x6b8   :  { %v1086_v5 = vsel %vm411_vm3, %v1001_v2, 0.0 }
 0x6b9   :  { %1292 = vmatprep.mubr.msk.f32.mxu1 %vm411_vm3, %v1000_v4  ;;  %1087 = vadd.xlane.f32.xlu1 %v1086_v5  ;;  %v1083_v6 = vsel %vm411_vm3, %v1000_v4, 0.0 }
 0x6ba   :  { %1084 = vadd.xlane.f32.xlu0 %v1083_v6  ;;  %1293 = vmatmul.mubr.msk.f32.vlgmr.msra.gmra.mxu1 %vm411_vm3, %v1001_v2 }
 0x742   :  { %v1088_v7 = vpop.xlane.xlu1 %1087 }
 0x743   :  { %v1085_v9 = vpop.xlane.xlu0 %1084  ;;  %1368 = vrcp.f32 %v1088_v7 }
 0x744   :  { %1370 = vrcp.f32 %v1085_v9 }
 0x750   :  { %v1369_v10 = vpop.eup %1368 }
 0x751   :  { %v1371_v16 = vpop.eup %1370 }
 0x77a   :  { %v1294_v12 = vpop.f32.mrf.mxu1 }
 0x77b   :  { %v1092_v15 = vmul.f32 %v1369_v10, %v1294_v12 }
 0x77c   :  { %v1074_v17 = vpop.f32.mrf.mxu1 }
 0x77d   :  { %v1091_v18 = vmul.f32 %v1371_v16, %v1074_v17  ;;  %v1101_v19 = vadd.f32 %v1140_v13, %v1092_v15 }
 0x77f   :  { %1104 = vmax.xlane.f32.xlu1 %v1101_v19  ;;  %v1100_v11 = vadd.f32 %v1140_v13, %v1091_v18 }
 0x781   :  { %1102 = vmax.xlane.f32.xlu0 %v1100_v11 }
 0x808   :  { %v1105_v20 = vpop.xlane.xlu1 %1104 }
 0x809   :  { %v1107_v21 = vsub.f32 %v1101_v19, %v1105_v20 }
 0x80a   :  { %v1103_v22 = vpop.xlane.xlu0 %1102 }
 0x80b   :  { %v1110_v23 = vmul.f32 1.442695, %v1107_v21  ;;  %v1106_v24 = vsub.f32 %v1100_v11, %v1103_v22 }
 0x80d   :  { %1372 = vpow2.f32 %v1110_v23  ;;  %v1108_v25 = vmul.f32 1.442695, %v1106_v24 }
 0x80f   :  { %1374 = vpow2.f32 %v1108_v25 }
 0x81a   :  { %v1373_v14 = vpop.eup %1372 }
 0x81b   :  { %1114 = vadd.xlane.f32.xlu1 %v1373_v14 }
 0x81c   :  { %v1375_v26 = vpop.eup %1374 }
 0x81d   :  { %1112 = vadd.xlane.f32.xlu0 %v1375_v26 }
 0x8a4   :  { %v1115_v27 = vpop.xlane.xlu1 %1114 }
 0x8a5   :  { %1376 = vlog2.f32 %v1115_v27 }
 0x8a6   :  { %v1113_v60 = vpop.xlane.xlu0 %1112 }
 0x8a7   :  { %1378 = vlog2.f32 %v1113_v60 }
 0x8b2   :  { %v1377_v28 = vpop.eup %1376 }
 0x8b3   :  { %v1119_v3 = vmul.f32 0.6931472, %v1377_v28 }
 0x8b4   :  { %v1379_v29 = vpop.eup %1378 }
 0x8b5   :  { %v1121_v30 = vsub.f32 %v1107_v21, %v1119_v3  ;;  %v1117_v31 = vmul.f32 0.6931472, %v1379_v29 }
 0x8b7   :  { %1123 = vst [vmem:[%s1823_s11 + $0x8] sm:$0xff] %v1121_v30  ;;  %v1120_v32 = vsub.f32 %v1106_v24, %v1117_v31 }
 0x8b9   :  { %1122 = vst [vmem:[%s1823_s11] sm:$0xff] %v1120_v32 }

</bundles_post_ra>
